<compile_context>
chip_gen: v7x
topology: tpu7x:2x2x1
jax: 0.10.0
libtpu: 0.0.40
codegen_flags: <defaults>
</compile_context>

<pallas_src>
import jax
import jax.numpy as jnp
from jax.experimental import pallas as pl
from jax.experimental.pallas import tpu as pltpu

# ---------------- model config (small, synthetic) ----------------
B = 2            # batch
S = 8            # sequence length
D = 32           # hidden size
H = 4            # attention heads
DH = D // H      # head dim
FF = 4 * D       # MLP intermediate (CLIP uses 4x)
P = 16           # projection dim
VOCAB = 49       # vocab size (last id = EOS, the largest id -> argmax pooling)
VOCAB_PAD = 64   # vocab padded to a lane-friendly contraction size
NLAYERS = 2
LN_EPS = 1e-5
NEG = -1e9


# ---------------- fused Pallas kernel ----------------
def _layernorm(h, g, b):
    mu = jnp.mean(h, axis=-1, keepdims=True)
    var = jnp.mean((h - mu) ** 2, axis=-1, keepdims=True)
    return (h - mu) * jax.lax.rsqrt(var + LN_EPS) * g + b


def clip_text_kernel(ids_ref, mask_ref, tok_ref, pos_ref,
                     ln1g_ref, ln1b_ref, wqkv_ref, bqkv_ref, wo_ref, bo_ref,
                     ln2g_ref, ln2b_ref, w1_ref, b1_ref, w2_ref, b2_ref,
                     lnfg_ref, lnfb_ref, wproj_ref,
                     o_ref):
    """Embed + all CLIP text-encoder layers + final LN + EOS pool + projection."""
    ids = ids_ref[...]                                  # (B, S) int32
    mask = mask_ref[...]                                # (B, S) int32

    # --- token embedding: one-hot matmul against the VMEM-resident table ---
    vcol = jax.lax.broadcasted_iota(jnp.int32, (B, S, VOCAB_PAD), 2)
    tok_onehot = jnp.where(vcol == ids[:, :, None], 1.0, 0.0)
    tok_onehot = tok_onehot.astype(jnp.bfloat16).reshape(B * S, VOCAB_PAD)
    x = jnp.dot(tok_onehot, tok_ref[...],
                preferred_element_type=jnp.float32)     # (B*S, D) f32

    # --- positional embedding (broadcast over batch) ---
    x = x + jnp.concatenate([pos_ref[...]] * B, axis=0)

    # --- additive attention bias (causal + key padding), built in-kernel ---
    qi = jax.lax.broadcasted_iota(jnp.int32, (B, S, S), 1)   # query position
    kj = jax.lax.broadcasted_iota(jnp.int32, (B, S, S), 2)   # key position
    key_ok = mask[:, None, :] > 0
    bias = jnp.where((kj <= qi) & key_ok, 0.0, NEG).astype(jnp.float32)

    for li in range(NLAYERS):                           # fused layer loop (static)
        # --- self-attention block (pre-LN) ---
        h = _layernorm(x, ln1g_ref[li], ln1b_ref[li])
        qkv = jnp.dot(h.astype(jnp.bfloat16), wqkv_ref[li],
                      preferred_element_type=jnp.float32) + bqkv_ref[li]   # (BS, 3D)
        q = qkv[:, :D].reshape(B, S, D)                 # DH**-0.5 folded into Wq/bq
        k = qkv[:, D:2 * D].reshape(B, S, D)
        v = qkv[:, 2 * D:].reshape(B, S, D)

        head_outs = []
        for hd in range(H):                             # independent heads (no serial chain)
            sl = slice(hd * DH, (hd + 1) * DH)
            s = jnp.einsum('bid,bjd->bij', q[:, :, sl], k[:, :, sl],
                           preferred_element_type=jnp.float32) + bias      # (B,S,S)
            s = s - jnp.max(s, axis=-1, keepdims=True)
            p = jnp.exp(s)
            p = p * pl.reciprocal(jnp.sum(p, axis=-1, keepdims=True), approx=True)
            head_outs.append(jnp.einsum('bij,bjd->bid', p, v[:, :, sl],
                                        preferred_element_type=jnp.float32))
        o = jnp.concatenate(head_outs, axis=-1).reshape(B * S, D)
        attn = jnp.dot(o.astype(jnp.bfloat16), wo_ref[li],
                       preferred_element_type=jnp.float32)                 # single Wo matmul
        x = x + attn + bo_ref[li]

        # --- MLP block (pre-LN, quick-GELU) ---
        h2 = _layernorm(x, ln2g_ref[li], ln2b_ref[li])
        m = jnp.dot(h2.astype(jnp.bfloat16), w1_ref[li],
                    preferred_element_type=jnp.float32) + b1_ref[li]
        m = m * jax.nn.sigmoid(1.702 * m)               # quick_gelu (f32 EUP)
        x = x + jnp.dot(m.astype(jnp.bfloat16), w2_ref[li],
                        preferred_element_type=jnp.float32) + b2_ref[li]

    # --- EOS pooling: argmax(input_ids) (first max), computed in-kernel ---
    pos = jax.lax.broadcasted_iota(jnp.int32, (B, S), 1)
    max_id = jnp.max(ids, axis=-1, keepdims=True)
    first_eos = jnp.min(jnp.where(ids == max_id, pos, S), axis=-1, keepdims=True)  # (B,1)
    pool_oh = (pos == first_eos).astype(jnp.float32)                               # (B,S)
    pooled = jnp.sum(pool_oh[:, :, None] * x.reshape(B, S, D), axis=1)             # (B,D)

    # final LayerNorm + bias-free text projection (pool-then-LN == LN-then-pool
    # because the one-hot pool selects exactly one row with coefficient 1.0)
    pooled = _layernorm(pooled, lnfg_ref[...], lnfb_ref[...])
    o_ref[...] = jnp.dot(pooled, wproj_ref[...], preferred_element_type=jnp.float32)


# ---------------- wrapper ----------------
def _vmem_spec():
    return pl.BlockSpec(memory_space=pltpu.MemorySpace.VMEM)


def clap_forward(params, input_ids, attention_mask):
    """Equivalent of CLIPModel.get_text_features(input_ids, attention_mask)."""
    args = [input_ids.astype(jnp.int32), attention_mask.astype(jnp.int32),
            params["token_emb"], params["pos_emb"],
            params["ln1_g"], params["ln1_b"], params["wqkv"], params["bqkv"],
            params["wo"], params["bo"], params["ln2_g"], params["ln2_b"],
            params["w1"], params["b1"], params["w2"], params["b2"],
            params["lnf_g"], params["lnf_b"], params["w_proj"]]

    return pl.pallas_call(
        clip_text_kernel,
        out_shape=jax.ShapeDtypeStruct((B, P), jnp.float32),
        in_specs=[_vmem_spec() for _ in args],
        out_specs=_vmem_spec(),
    )(*args)


# ---------------- parameter init (deterministic, synthetic) ----------------
# TODO(synk): pretrained HF CLIPModel weights / tokenizer cannot be loaded in-script;
# deterministic synthetic weights (same architecture) are used instead.
def init_params(key):
    def nrm(k, shape, scale=0.02):
        return scale * jax.random.normal(k, shape, dtype=jnp.float32)

    keys = jax.random.split(key, 7)
    scale = DH ** -0.5

    tok = nrm(keys[0], (VOCAB, D))
    tok = jnp.pad(tok, ((0, VOCAB_PAD - VOCAB), (0, 0)))   # pad vocab axis to 64

    wqkv = nrm(keys[3], (NLAYERS, D, 3 * D))
    bqkv = jnp.zeros((NLAYERS, 1, 3 * D), jnp.float32)
    # fold the attention scale DH**-0.5 into the query third of the fused QKV proj
    wqkv = wqkv.at[:, :, :D].multiply(scale)
    bqkv = bqkv.at[:, :, :D].multiply(scale)

    return {
        # big matmul weights in bf16 (f32 accumulation in-kernel); the rest f32
        "token_emb": tok.astype(jnp.bfloat16),
        "pos_emb": nrm(keys[1], (S, D)),
        "lnf_g": jnp.ones((1, D), jnp.float32),
        "lnf_b": jnp.zeros((1, D), jnp.float32),
        "w_proj": nrm(keys[2], (D, P)),                 # text_projection (no bias), (in,out)
        # per-layer weights stacked with a leading layer axis; Linear weights
        # stored pre-transposed as (in, out): y = x @ W + b.  q/k/v fused.
        "ln1_g": jnp.ones((NLAYERS, 1, D), jnp.float32),
        "ln1_b": jnp.zeros((NLAYERS, 1, D), jnp.float32),
        "wqkv": wqkv.astype(jnp.bfloat16),
        "bqkv": bqkv,
        "wo": nrm(keys[4], (NLAYERS, D, D)).astype(jnp.bfloat16),
        "bo": jnp.zeros((NLAYERS, 1, D), jnp.float32),
        "ln2_g": jnp.ones((NLAYERS, 1, D), jnp.float32),
        "ln2_b": jnp.zeros((NLAYERS, 1, D), jnp.float32),
        "w1": nrm(keys[5], (NLAYERS, D, FF)).astype(jnp.bfloat16),
        "b1": jnp.zeros((NLAYERS, 1, FF), jnp.float32),
        "w2": nrm(keys[6], (NLAYERS, FF, D)).astype(jnp.bfloat16),
        "b2": jnp.zeros((NLAYERS, 1, D), jnp.float32),
    }


if __name__ == "__main__":
    key = jax.random.PRNGKey(0)
    pkey, ikey = jax.random.split(key)
    params = init_params(pkey)

    # deterministic synthetic token ids: valid tokens, EOS (= VOCAB-1) then padding
    ids = jax.random.randint(ikey, (B, S), minval=1, maxval=VOCAB - 1, dtype=jnp.int32)
    ids = ids.at[0, 5].set(VOCAB - 1)   # EOS for seq 0 at position 5
    ids = ids.at[0, 6:].set(0)          # padding
    ids = ids.at[1, 7].set(VOCAB - 1)   # EOS for seq 1 at last position
    attention_mask = jnp.array(
        [[1, 1, 1, 1, 1, 1, 0, 0],
         [1, 1, 1, 1, 1, 1, 1, 1]], dtype=jnp.int32)

    feats = clap_forward(params, ids, attention_mask)
    feats = jax.block_until_ready(feats)
    assert feats.shape == (B, P) and feats.dtype == jnp.float32
    assert bool(jnp.all(jnp.isfinite(feats)))
    print("KERNEL_OK")
</pallas_src>

<mosaic_0001>
module attributes {stable_mosaic.version = 11 : i64} {
  func.func @clip_text_kernel(%arg0: memref<2x8xi32, #tpu.memory_space<vmem>>, %arg1: memref<2x8xi32, #tpu.memory_space<vmem>>, %arg2: memref<64x32xbf16, #tpu.memory_space<vmem>>, %arg3: memref<8x32xf32, #tpu.memory_space<vmem>>, %arg4: memref<2x1x32xf32, #tpu.memory_space<vmem>>, %arg5: memref<2x1x32xf32, #tpu.memory_space<vmem>>, %arg6: memref<2x32x96xbf16, #tpu.memory_space<vmem>>, %arg7: memref<2x1x96xf32, #tpu.memory_space<vmem>>, %arg8: memref<2x32x32xbf16, #tpu.memory_space<vmem>>, %arg9: memref<2x1x32xf32, #tpu.memory_space<vmem>>, %arg10: memref<2x1x32xf32, #tpu.memory_space<vmem>>, %arg11: memref<2x1x32xf32, #tpu.memory_space<vmem>>, %arg12: memref<2x32x128xbf16, #tpu.memory_space<vmem>>, %arg13: memref<2x1x128xf32, #tpu.memory_space<vmem>>, %arg14: memref<2x128x32xbf16, #tpu.memory_space<vmem>>, %arg15: memref<2x1x32xf32, #tpu.memory_space<vmem>>, %arg16: memref<1x32xf32, #tpu.memory_space<vmem>>, %arg17: memref<1x32xf32, #tpu.memory_space<vmem>>, %arg18: memref<32x16xf32, #tpu.memory_space<vmem>>, %arg19: memref<2x16xf32, #tpu.memory_space<vmem>>) attributes {dimension_semantics = [], scalar_prefetch = 0 : i64, scratch_operands = 0 : i64, tpu.core_type = #tpu.core_type<tc>} {
    %c0 = arith.constant 0 : index
    %c0_0 = arith.constant 0 : index
    %0 = vector.load %arg0[%c0, %c0_0] : memref<2x8xi32, #tpu.memory_space<vmem>>, vector<2x8xi32>
    %c0_1 = arith.constant 0 : index
    %c0_2 = arith.constant 0 : index
    %1 = vector.load %arg1[%c0_1, %c0_2] : memref<2x8xi32, #tpu.memory_space<vmem>>, vector<2x8xi32>
    %2 = tpu.iota {dimensions = array<i32: 2>} : vector<2x8x64xi32>
    %3 = vector.shape_cast %0 : vector<2x8xi32> to vector<2x8x1xi32>
    %4 = vector.broadcast %3 : vector<2x8x1xi32> to vector<2x8x64xi32>
    %5 = arith.cmpi eq, %2, %4 : vector<2x8x64xi32>
    %cst = arith.constant 1.000000e+00 : f32
    %cst_3 = arith.constant 0.000000e+00 : f32
    %6 = vector.broadcast %cst : f32 to vector<2x8x64xf32>
    %7 = vector.broadcast %cst_3 : f32 to vector<2x8x64xf32>
    %8 = arith.select %5, %6, %7 : vector<2x8x64xi1>, vector<2x8x64xf32>
    %9 = arith.truncf %8 : vector<2x8x64xf32> to vector<2x8x64xbf16>
    %10 = vector.shape_cast %9 : vector<2x8x64xbf16> to vector<16x64xbf16>
    %c0_4 = arith.constant 0 : index
    %c0_5 = arith.constant 0 : index
    %11 = vector.load %arg2[%c0_4, %c0_5] : memref<64x32xbf16, #tpu.memory_space<vmem>>, vector<64x32xbf16>
    %cst_6 = arith.constant dense<0.000000e+00> : vector<16x32xf32>
    %12 = tpu.matmul %10, %11, %cst_6 {dimension_numbers = #tpu.dot_dimension_numbers<[1], [0], [0], [1], [0, 0, 1, 1], [], []>} : vector<16x64xbf16>, vector<64x32xbf16>, vector<16x32xf32> -> vector<16x32xf32>
    %c0_7 = arith.constant 0 : index
    %c0_8 = arith.constant 0 : index
    %13 = vector.load %arg3[%c0_7, %c0_8] : memref<8x32xf32, #tpu.memory_space<vmem>>, vector<8x32xf32>
    %14 = tpu.concatenate %13, %13 in 0 : vector<8x32xf32>, vector<8x32xf32> -> vector<16x32xf32>
    %15 = arith.addf %12, %14 : vector<16x32xf32>
    %16 = tpu.iota {dimensions = array<i32: 1>} : vector<2x8x8xi32>
    %17 = tpu.iota {dimensions = array<i32: 2>} : vector<2x8x8xi32>
    %18 = vector.shape_cast %1 : vector<2x8xi32> to vector<2x1x8xi32>
    %c0_i32 = arith.constant 0 : i32
    %19 = vector.broadcast %c0_i32 : i32 to vector<2x1x8xi32>
    %20 = arith.cmpi sgt, %18, %19 : vector<2x1x8xi32>
    %21 = arith.cmpi sle, %17, %16 : vector<2x8x8xi32>
    %22 = vector.broadcast %20 : vector<2x1x8xi1> to vector<2x8x8xi1>
    %23 = arith.andi %21, %22 : vector<2x8x8xi1>
    %cst_9 = arith.constant 0.000000e+00 : f32
    %cst_10 = arith.constant -1.000000e+09 : f32
    %24 = vector.broadcast %cst_9 : f32 to vector<2x8x8xf32>
    %25 = vector.broadcast %cst_10 : f32 to vector<2x8x8xf32>
    %26 = arith.select %23, %24, %25 : vector<2x8x8xi1>, vector<2x8x8xf32>
    %c0_11 = arith.constant 0 : index
    %c0_12 = arith.constant 0 : index
    %c0_13 = arith.constant 0 : index
    %27 = vector.load %arg4[%c0_11, %c0_12, %c0_13] : memref<2x1x32xf32, #tpu.memory_space<vmem>>, vector<1x1x32xf32>
    %28 = vector.shape_cast %27 : vector<1x1x32xf32> to vector<1x32xf32>
    %c0_14 = arith.constant 0 : index
    %c0_15 = arith.constant 0 : index
    %c0_16 = arith.constant 0 : index
    %29 = vector.load %arg5[%c0_14, %c0_15, %c0_16] : memref<2x1x32xf32, #tpu.memory_space<vmem>>, vector<1x1x32xf32>
    %30 = vector.shape_cast %29 : vector<1x1x32xf32> to vector<1x32xf32>
    %cst_17 = arith.constant dense<0.000000e+00> : vector<16xf32>
    %31 = vector.multi_reduction <add>, %15, %cst_17 [1] : vector<16x32xf32> to vector<16xf32>
    %32 = vector.shape_cast %31 : vector<16xf32> to vector<16x1xf32>
    %cst_18 = arith.constant 3.200000e+01 : f32
    %33 = vector.broadcast %cst_18 : f32 to vector<16x1xf32>
    %34 = arith.divf %32, %33 : vector<16x1xf32>
    %35 = vector.broadcast %34 : vector<16x1xf32> to vector<16x32xf32>
    %36 = arith.subf %15, %35 : vector<16x32xf32>
    %37 = arith.mulf %36, %36 : vector<16x32xf32>
    %cst_19 = arith.constant dense<0.000000e+00> : vector<16xf32>
    %38 = vector.multi_reduction <add>, %37, %cst_19 [1] : vector<16x32xf32> to vector<16xf32>
    %39 = vector.shape_cast %38 : vector<16xf32> to vector<16x1xf32>
    %cst_20 = arith.constant 3.200000e+01 : f32
    %40 = vector.broadcast %cst_20 : f32 to vector<16x1xf32>
    %41 = arith.divf %39, %40 : vector<16x1xf32>
    %42 = vector.broadcast %34 : vector<16x1xf32> to vector<16x32xf32>
    %43 = arith.subf %15, %42 : vector<16x32xf32>
    %cst_21 = arith.constant 9.99999974E-6 : f32
    %44 = vector.broadcast %cst_21 : f32 to vector<16x1xf32>
    %45 = arith.addf %41, %44 : vector<16x1xf32>
    %46 = math.rsqrt %45 : vector<16x1xf32>
    %47 = vector.broadcast %46 : vector<16x1xf32> to vector<16x32xf32>
    %48 = arith.mulf %43, %47 : vector<16x32xf32>
    %49 = vector.broadcast %28 : vector<1x32xf32> to vector<16x32xf32>
    %50 = arith.mulf %48, %49 : vector<16x32xf32>
    %51 = vector.broadcast %30 : vector<1x32xf32> to vector<16x32xf32>
    %52 = arith.addf %50, %51 : vector<16x32xf32>
    %53 = arith.truncf %52 : vector<16x32xf32> to vector<16x32xbf16>
    %c0_22 = arith.constant 0 : index
    %c0_23 = arith.constant 0 : index
    %c0_24 = arith.constant 0 : index
    %54 = vector.load %arg6[%c0_22, %c0_23, %c0_24] : memref<2x32x96xbf16, #tpu.memory_space<vmem>>, vector<1x32x96xbf16>
    %55 = vector.shape_cast %54 : vector<1x32x96xbf16> to vector<32x96xbf16>
    %cst_25 = arith.constant dense<0.000000e+00> : vector<16x96xf32>
    %56 = tpu.matmul %53, %55, %cst_25 {dimension_numbers = #tpu.dot_dimension_numbers<[1], [0], [0], [1], [0, 0, 1, 1], [], []>} : vector<16x32xbf16>, vector<32x96xbf16>, vector<16x96xf32> -> vector<16x96xf32>
    %c0_26 = arith.constant 0 : index
    %c0_27 = arith.constant 0 : index
    %c0_28 = arith.constant 0 : index
    %57 = vector.load %arg7[%c0_26, %c0_27, %c0_28] : memref<2x1x96xf32, #tpu.memory_space<vmem>>, vector<1x1x96xf32>
    %58 = vector.shape_cast %57 : vector<1x1x96xf32> to vector<1x96xf32>
    %59 = vector.broadcast %58 : vector<1x96xf32> to vector<16x96xf32>
    %60 = arith.addf %56, %59 : vector<16x96xf32>
    %61 = vector.extract_strided_slice %60 {offsets = [0, 0], sizes = [16, 32], strides = [1, 1]} : vector<16x96xf32> to vector<16x32xf32>
    %62 = vector.shape_cast %61 : vector<16x32xf32> to vector<2x8x32xf32>
    %63 = vector.extract_strided_slice %60 {offsets = [0, 32], sizes = [16, 32], strides = [1, 1]} : vector<16x96xf32> to vector<16x32xf32>
    %64 = vector.shape_cast %63 : vector<16x32xf32> to vector<2x8x32xf32>
    %65 = vector.extract_strided_slice %60 {offsets = [0, 64], sizes = [16, 32], strides = [1, 1]} : vector<16x96xf32> to vector<16x32xf32>
    %66 = vector.shape_cast %65 : vector<16x32xf32> to vector<2x8x32xf32>
    %67 = vector.extract_strided_slice %62 {offsets = [0, 0, 0], sizes = [2, 8, 8], strides = [1, 1, 1]} : vector<2x8x32xf32> to vector<2x8x8xf32>
    %68 = vector.extract_strided_slice %64 {offsets = [0, 0, 0], sizes = [2, 8, 8], strides = [1, 1, 1]} : vector<2x8x32xf32> to vector<2x8x8xf32>
    "tpu.trace_start"() <{level = 10 : i32, message = "bid,bjd->bij"}> : () -> ()
    %cst_29 = arith.constant dense<0.000000e+00> : vector<2x8x8xf32>
    %69 = tpu.matmul %67, %68, %cst_29 {dimension_numbers = #tpu.dot_dimension_numbers<[2], [2], [1], [1], [0, 0, 0, 1, 1, 1], [0], [0]>} : vector<2x8x8xf32>, vector<2x8x8xf32>, vector<2x8x8xf32> -> vector<2x8x8xf32>
    "tpu.trace_stop"() : () -> ()
    %70 = arith.addf %69, %26 : vector<2x8x8xf32>
    %cst_30 = arith.constant dense<0xFF800000> : vector<2x8xf32>
    %71 = vector.multi_reduction <maximumf>, %70, %cst_30 [2] : vector<2x8x8xf32> to vector<2x8xf32>
    %72 = vector.shape_cast %71 : vector<2x8xf32> to vector<2x8x1xf32>
    %73 = vector.broadcast %72 : vector<2x8x1xf32> to vector<2x8x8xf32>
    %74 = arith.subf %70, %73 : vector<2x8x8xf32>
    %75 = math.exp %74 : vector<2x8x8xf32>
    %cst_31 = arith.constant dense<0.000000e+00> : vector<2x8xf32>
    %76 = vector.multi_reduction <add>, %75, %cst_31 [2] : vector<2x8x8xf32> to vector<2x8xf32>
    %77 = vector.shape_cast %76 : vector<2x8xf32> to vector<2x8x1xf32>
    %78 = tpu.reciprocal %77 {approx = true} : vector<2x8x1xf32> -> vector<2x8x1xf32>
    %79 = vector.broadcast %78 : vector<2x8x1xf32> to vector<2x8x8xf32>
    %80 = arith.mulf %75, %79 : vector<2x8x8xf32>
    %81 = vector.extract_strided_slice %66 {offsets = [0, 0, 0], sizes = [2, 8, 8], strides = [1, 1, 1]} : vector<2x8x32xf32> to vector<2x8x8xf32>
    "tpu.trace_start"() <{level = 10 : i32, message = "bij,bjd->bid"}> : () -> ()
    %cst_32 = arith.constant dense<0.000000e+00> : vector<2x8x8xf32>
    %82 = tpu.matmul %80, %81, %cst_32 {dimension_numbers = #tpu.dot_dimension_numbers<[2], [1], [1], [2], [0, 0, 0, 1, 1, 2], [0], [0]>} : vector<2x8x8xf32>, vector<2x8x8xf32>, vector<2x8x8xf32> -> vector<2x8x8xf32>
    "tpu.trace_stop"() : () -> ()
    %83 = vector.extract_strided_slice %62 {offsets = [0, 0, 8], sizes = [2, 8, 8], strides = [1, 1, 1]} : vector<2x8x32xf32> to vector<2x8x8xf32>
    %84 = vector.extract_strided_slice %64 {offsets = [0, 0, 8], sizes = [2, 8, 8], strides = [1, 1, 1]} : vector<2x8x32xf32> to vector<2x8x8xf32>
    "tpu.trace_start"() <{level = 10 : i32, message = "bid,bjd->bij"}> : () -> ()
    %cst_33 = arith.constant dense<0.000000e+00> : vector<2x8x8xf32>
    %85 = tpu.matmul %83, %84, %cst_33 {dimension_numbers = #tpu.dot_dimension_numbers<[2], [2], [1], [1], [0, 0, 0, 1, 1, 1], [0], [0]>} : vector<2x8x8xf32>, vector<2x8x8xf32>, vector<2x8x8xf32> -> vector<2x8x8xf32>
    "tpu.trace_stop"() : () -> ()
    %86 = arith.addf %85, %26 : vector<2x8x8xf32>
    %cst_34 = arith.constant dense<0xFF800000> : vector<2x8xf32>
    %87 = vector.multi_reduction <maximumf>, %86, %cst_34 [2] : vector<2x8x8xf32> to vector<2x8xf32>
    %88 = vector.shape_cast %87 : vector<2x8xf32> to vector<2x8x1xf32>
    %89 = vector.broadcast %88 : vector<2x8x1xf32> to vector<2x8x8xf32>
    %90 = arith.subf %86, %89 : vector<2x8x8xf32>
    %91 = math.exp %90 : vector<2x8x8xf32>
    %cst_35 = arith.constant dense<0.000000e+00> : vector<2x8xf32>
    %92 = vector.multi_reduction <add>, %91, %cst_35 [2] : vector<2x8x8xf32> to vector<2x8xf32>
    %93 = vector.shape_cast %92 : vector<2x8xf32> to vector<2x8x1xf32>
    %94 = tpu.reciprocal %93 {approx = true} : vector<2x8x1xf32> -> vector<2x8x1xf32>
    %95 = vector.broadcast %94 : vector<2x8x1xf32> to vector<2x8x8xf32>
    %96 = arith.mulf %91, %95 : vector<2x8x8xf32>
    %97 = vector.extract_strided_slice %66 {offsets = [0, 0, 8], sizes = [2, 8, 8], strides = [1, 1, 1]} : vector<2x8x32xf32> to vector<2x8x8xf32>
    "tpu.trace_start"() <{level = 10 : i32, message = "bij,bjd->bid"}> : () -> ()
    %cst_36 = arith.constant dense<0.000000e+00> : vector<2x8x8xf32>
    %98 = tpu.matmul %96, %97, %cst_36 {dimension_numbers = #tpu.dot_dimension_numbers<[2], [1], [1], [2], [0, 0, 0, 1, 1, 2], [0], [0]>} : vector<2x8x8xf32>, vector<2x8x8xf32>, vector<2x8x8xf32> -> vector<2x8x8xf32>
    "tpu.trace_stop"() : () -> ()
    %99 = vector.extract_strided_slice %62 {offsets = [0, 0, 16], sizes = [2, 8, 8], strides = [1, 1, 1]} : vector<2x8x32xf32> to vector<2x8x8xf32>
    %100 = vector.extract_strided_slice %64 {offsets = [0, 0, 16], sizes = [2, 8, 8], strides = [1, 1, 1]} : vector<2x8x32xf32> to vector<2x8x8xf32>
    "tpu.trace_start"() <{level = 10 : i32, message = "bid,bjd->bij"}> : () -> ()
    %cst_37 = arith.constant dense<0.000000e+00> : vector<2x8x8xf32>
    %101 = tpu.matmul %99, %100, %cst_37 {dimension_numbers = #tpu.dot_dimension_numbers<[2], [2], [1], [1], [0, 0, 0, 1, 1, 1], [0], [0]>} : vector<2x8x8xf32>, vector<2x8x8xf32>, vector<2x8x8xf32> -> vector<2x8x8xf32>
    "tpu.trace_stop"() : () -> ()
    %102 = arith.addf %101, %26 : vector<2x8x8xf32>
    %cst_38 = arith.constant dense<0xFF800000> : vector<2x8xf32>
    %103 = vector.multi_reduction <maximumf>, %102, %cst_38 [2] : vector<2x8x8xf32> to vector<2x8xf32>
    %104 = vector.shape_cast %103 : vector<2x8xf32> to vector<2x8x1xf32>
    %105 = vector.broadcast %104 : vector<2x8x1xf32> to vector<2x8x8xf32>
    %106 = arith.subf %102, %105 : vector<2x8x8xf32>
    %107 = math.exp %106 : vector<2x8x8xf32>
    %cst_39 = arith.constant dense<0.000000e+00> : vector<2x8xf32>
    %108 = vector.multi_reduction <add>, %107, %cst_39 [2] : vector<2x8x8xf32> to vector<2x8xf32>
    %109 = vector.shape_cast %108 : vector<2x8xf32> to vector<2x8x1xf32>
    %110 = tpu.reciprocal %109 {approx = true} : vector<2x8x1xf32> -> vector<2x8x1xf32>
    %111 = vector.broadcast %110 : vector<2x8x1xf32> to vector<2x8x8xf32>
    %112 = arith.mulf %107, %111 : vector<2x8x8xf32>
    %113 = vector.extract_strided_slice %66 {offsets = [0, 0, 16], sizes = [2, 8, 8], strides = [1, 1, 1]} : vector<2x8x32xf32> to vector<2x8x8xf32>
    "tpu.trace_start"() <{level = 10 : i32, message = "bij,bjd->bid"}> : () -> ()
    %cst_40 = arith.constant dense<0.000000e+00> : vector<2x8x8xf32>
    %114 = tpu.matmul %112, %113, %cst_40 {dimension_numbers = #tpu.dot_dimension_numbers<[2], [1], [1], [2], [0, 0, 0, 1, 1, 2], [0], [0]>} : vector<2x8x8xf32>, vector<2x8x8xf32>, vector<2x8x8xf32> -> vector<2x8x8xf32>
    "tpu.trace_stop"() : () -> ()
    %115 = vector.extract_strided_slice %62 {offsets = [0, 0, 24], sizes = [2, 8, 8], strides = [1, 1, 1]} : vector<2x8x32xf32> to vector<2x8x8xf32>
    %116 = vector.extract_strided_slice %64 {offsets = [0, 0, 24], sizes = [2, 8, 8], strides = [1, 1, 1]} : vector<2x8x32xf32> to vector<2x8x8xf32>
    "tpu.trace_start"() <{level = 10 : i32, message = "bid,bjd->bij"}> : () -> ()
    %cst_41 = arith.constant dense<0.000000e+00> : vector<2x8x8xf32>
    %117 = tpu.matmul %115, %116, %cst_41 {dimension_numbers = #tpu.dot_dimension_numbers<[2], [2], [1], [1], [0, 0, 0, 1, 1, 1], [0], [0]>} : vector<2x8x8xf32>, vector<2x8x8xf32>, vector<2x8x8xf32> -> vector<2x8x8xf32>
    "tpu.trace_stop"() : () -> ()
    %118 = arith.addf %117, %26 : vector<2x8x8xf32>
    %cst_42 = arith.constant dense<0xFF800000> : vector<2x8xf32>
    %119 = vector.multi_reduction <maximumf>, %118, %cst_42 [2] : vector<2x8x8xf32> to vector<2x8xf32>
    %120 = vector.shape_cast %119 : vector<2x8xf32> to vector<2x8x1xf32>
    %121 = vector.broadcast %120 : vector<2x8x1xf32> to vector<2x8x8xf32>
    %122 = arith.subf %118, %121 : vector<2x8x8xf32>
    %123 = math.exp %122 : vector<2x8x8xf32>
    %cst_43 = arith.constant dense<0.000000e+00> : vector<2x8xf32>
    %124 = vector.multi_reduction <add>, %123, %cst_43 [2] : vector<2x8x8xf32> to vector<2x8xf32>
    %125 = vector.shape_cast %124 : vector<2x8xf32> to vector<2x8x1xf32>
    %126 = tpu.reciprocal %125 {approx = true} : vector<2x8x1xf32> -> vector<2x8x1xf32>
    %127 = vector.broadcast %126 : vector<2x8x1xf32> to vector<2x8x8xf32>
    %128 = arith.mulf %123, %127 : vector<2x8x8xf32>
    %129 = vector.extract_strided_slice %66 {offsets = [0, 0, 24], sizes = [2, 8, 8], strides = [1, 1, 1]} : vector<2x8x32xf32> to vector<2x8x8xf32>
    "tpu.trace_start"() <{level = 10 : i32, message = "bij,bjd->bid"}> : () -> ()
    %cst_44 = arith.constant dense<0.000000e+00> : vector<2x8x8xf32>
    %130 = tpu.matmul %128, %129, %cst_44 {dimension_numbers = #tpu.dot_dimension_numbers<[2], [1], [1], [2], [0, 0, 0, 1, 1, 2], [0], [0]>} : vector<2x8x8xf32>, vector<2x8x8xf32>, vector<2x8x8xf32> -> vector<2x8x8xf32>
    "tpu.trace_stop"() : () -> ()
    %131 = tpu.concatenate %82, %98, %114, %130 in 2 : vector<2x8x8xf32>, vector<2x8x8xf32>, vector<2x8x8xf32>, vector<2x8x8xf32> -> vector<2x8x32xf32>
    %132 = vector.shape_cast %131 : vector<2x8x32xf32> to vector<16x32xf32>
    %133 = arith.truncf %132 : vector<16x32xf32> to vector<16x32xbf16>
    %c0_45 = arith.constant 0 : index
    %c0_46 = arith.constant 0 : index
    %c0_47 = arith.constant 0 : index
    %134 = vector.load %arg8[%c0_45, %c0_46, %c0_47] : memref<2x32x32xbf16, #tpu.memory_space<vmem>>, vector<1x32x32xbf16>
    %135 = vector.shape_cast %134 : vector<1x32x32xbf16> to vector<32x32xbf16>
    %cst_48 = arith.constant dense<0.000000e+00> : vector<16x32xf32>
    %136 = tpu.matmul %133, %135, %cst_48 {dimension_numbers = #tpu.dot_dimension_numbers<[1], [0], [0], [1], [0, 0, 1, 1], [], []>} : vector<16x32xbf16>, vector<32x32xbf16>, vector<16x32xf32> -> vector<16x32xf32>
    %137 = arith.addf %15, %136 : vector<16x32xf32>
    %c0_49 = arith.constant 0 : index
    %c0_50 = arith.constant 0 : index
    %c0_51 = arith.constant 0 : index
    %138 = vector.load %arg9[%c0_49, %c0_50, %c0_51] : memref<2x1x32xf32, #tpu.memory_space<vmem>>, vector<1x1x32xf32>
    %139 = vector.shape_cast %138 : vector<1x1x32xf32> to vector<1x32xf32>
    %140 = vector.broadcast %139 : vector<1x32xf32> to vector<16x32xf32>
    %141 = arith.addf %137, %140 : vector<16x32xf32>
    %c0_52 = arith.constant 0 : index
    %c0_53 = arith.constant 0 : index
    %c0_54 = arith.constant 0 : index
    %142 = vector.load %arg10[%c0_52, %c0_53, %c0_54] : memref<2x1x32xf32, #tpu.memory_space<vmem>>, vector<1x1x32xf32>
    %143 = vector.shape_cast %142 : vector<1x1x32xf32> to vector<1x32xf32>
    %c0_55 = arith.constant 0 : index
    %c0_56 = arith.constant 0 : index
    %c0_57 = arith.constant 0 : index
    %144 = vector.load %arg11[%c0_55, %c0_56, %c0_57] : memref<2x1x32xf32, #tpu.memory_space<vmem>>, vector<1x1x32xf32>
    %145 = vector.shape_cast %144 : vector<1x1x32xf32> to vector<1x32xf32>
    %cst_58 = arith.constant dense<0.000000e+00> : vector<16xf32>
    %146 = vector.multi_reduction <add>, %141, %cst_58 [1] : vector<16x32xf32> to vector<16xf32>
    %147 = vector.shape_cast %146 : vector<16xf32> to vector<16x1xf32>
    %cst_59 = arith.constant 3.200000e+01 : f32
    %148 = vector.broadcast %cst_59 : f32 to vector<16x1xf32>
    %149 = arith.divf %147, %148 : vector<16x1xf32>
    %150 = vector.broadcast %149 : vector<16x1xf32> to vector<16x32xf32>
    %151 = arith.subf %141, %150 : vector<16x32xf32>
    %152 = arith.mulf %151, %151 : vector<16x32xf32>
    %cst_60 = arith.constant dense<0.000000e+00> : vector<16xf32>
    %153 = vector.multi_reduction <add>, %152, %cst_60 [1] : vector<16x32xf32> to vector<16xf32>
    %154 = vector.shape_cast %153 : vector<16xf32> to vector<16x1xf32>
    %cst_61 = arith.constant 3.200000e+01 : f32
    %155 = vector.broadcast %cst_61 : f32 to vector<16x1xf32>
    %156 = arith.divf %154, %155 : vector<16x1xf32>
    %157 = vector.broadcast %149 : vector<16x1xf32> to vector<16x32xf32>
    %158 = arith.subf %141, %157 : vector<16x32xf32>
    %cst_62 = arith.constant 9.99999974E-6 : f32
    %159 = vector.broadcast %cst_62 : f32 to vector<16x1xf32>
    %160 = arith.addf %156, %159 : vector<16x1xf32>
    %161 = math.rsqrt %160 : vector<16x1xf32>
    %162 = vector.broadcast %161 : vector<16x1xf32> to vector<16x32xf32>
    %163 = arith.mulf %158, %162 : vector<16x32xf32>
    %164 = vector.broadcast %143 : vector<1x32xf32> to vector<16x32xf32>
    %165 = arith.mulf %163, %164 : vector<16x32xf32>
    %166 = vector.broadcast %145 : vector<1x32xf32> to vector<16x32xf32>
    %167 = arith.addf %165, %166 : vector<16x32xf32>
    %168 = arith.truncf %167 : vector<16x32xf32> to vector<16x32xbf16>
    %c0_63 = arith.constant 0 : index
    %c0_64 = arith.constant 0 : index
    %c0_65 = arith.constant 0 : index
    %169 = vector.load %arg12[%c0_63, %c0_64, %c0_65] : memref<2x32x128xbf16, #tpu.memory_space<vmem>>, vector<1x32x128xbf16>
    %170 = vector.shape_cast %169 : vector<1x32x128xbf16> to vector<32x128xbf16>
    %cst_66 = arith.constant dense<0.000000e+00> : vector<16x128xf32>
    %171 = tpu.matmul %168, %170, %cst_66 {dimension_numbers = #tpu.dot_dimension_numbers<[1], [0], [0], [1], [0, 0, 1, 1], [], []>} : vector<16x32xbf16>, vector<32x128xbf16>, vector<16x128xf32> -> vector<16x128xf32>
    %c0_67 = arith.constant 0 : index
    %c0_68 = arith.constant 0 : index
    %c0_69 = arith.constant 0 : index
    %172 = vector.load %arg13[%c0_67, %c0_68, %c0_69] : memref<2x1x128xf32, #tpu.memory_space<vmem>>, vector<1x1x128xf32>
    %173 = vector.shape_cast %172 : vector<1x1x128xf32> to vector<1x128xf32>
    %174 = vector.broadcast %173 : vector<1x128xf32> to vector<16x128xf32>
    %175 = arith.addf %171, %174 : vector<16x128xf32>
    %cst_70 = arith.constant 1.702000e+00 : f32
    %176 = vector.broadcast %cst_70 : f32 to vector<16x128xf32>
    %177 = arith.mulf %176, %175 : vector<16x128xf32>
    %178 = arith.negf %177 : vector<16x128xf32>
    %179 = math.exp %178 : vector<16x128xf32>
    %cst_71 = arith.constant 1.000000e+00 : f32
    %180 = vector.broadcast %cst_71 : f32 to vector<16x128xf32>
    %181 = arith.addf %180, %179 : vector<16x128xf32>
    %182 = arith.divf %180, %181 : vector<16x128xf32>
    %183 = arith.mulf %175, %182 : vector<16x128xf32>
    %184 = arith.truncf %183 : vector<16x128xf32> to vector<16x128xbf16>
    %c0_72 = arith.constant 0 : index
    %c0_73 = arith.constant 0 : index
    %c0_74 = arith.constant 0 : index
    %185 = vector.load %arg14[%c0_72, %c0_73, %c0_74] : memref<2x128x32xbf16, #tpu.memory_space<vmem>>, vector<1x128x32xbf16>
    %186 = vector.shape_cast %185 : vector<1x128x32xbf16> to vector<128x32xbf16>
    %cst_75 = arith.constant dense<0.000000e+00> : vector<16x32xf32>
    %187 = tpu.matmul %184, %186, %cst_75 {dimension_numbers = #tpu.dot_dimension_numbers<[1], [0], [0], [1], [0, 0, 1, 1], [], []>} : vector<16x128xbf16>, vector<128x32xbf16>, vector<16x32xf32> -> vector<16x32xf32>
    %188 = arith.addf %141, %187 : vector<16x32xf32>
    %c0_76 = arith.constant 0 : index
    %c0_77 = arith.constant 0 : index
    %c0_78 = arith.constant 0 : index
    %189 = vector.load %arg15[%c0_76, %c0_77, %c0_78] : memref<2x1x32xf32, #tpu.memory_space<vmem>>, vector<1x1x32xf32>
    %190 = vector.shape_cast %189 : vector<1x1x32xf32> to vector<1x32xf32>
    %191 = vector.broadcast %190 : vector<1x32xf32> to vector<16x32xf32>
    %192 = arith.addf %188, %191 : vector<16x32xf32>
    %c1 = arith.constant 1 : index
    %c0_79 = arith.constant 0 : index
    %c0_80 = arith.constant 0 : index
    %193 = vector.load %arg4[%c1, %c0_79, %c0_80] : memref<2x1x32xf32, #tpu.memory_space<vmem>>, vector<1x1x32xf32>
    %194 = vector.shape_cast %193 : vector<1x1x32xf32> to vector<1x32xf32>
    %c1_81 = arith.constant 1 : index
    %c0_82 = arith.constant 0 : index
    %c0_83 = arith.constant 0 : index
    %195 = vector.load %arg5[%c1_81, %c0_82, %c0_83] : memref<2x1x32xf32, #tpu.memory_space<vmem>>, vector<1x1x32xf32>
    %196 = vector.shape_cast %195 : vector<1x1x32xf32> to vector<1x32xf32>
    %cst_84 = arith.constant dense<0.000000e+00> : vector<16xf32>
    %197 = vector.multi_reduction <add>, %192, %cst_84 [1] : vector<16x32xf32> to vector<16xf32>
    %198 = vector.shape_cast %197 : vector<16xf32> to vector<16x1xf32>
    %cst_85 = arith.constant 3.200000e+01 : f32
    %199 = vector.broadcast %cst_85 : f32 to vector<16x1xf32>
    %200 = arith.divf %198, %199 : vector<16x1xf32>
    %201 = vector.broadcast %200 : vector<16x1xf32> to vector<16x32xf32>
    %202 = arith.subf %192, %201 : vector<16x32xf32>
    %203 = arith.mulf %202, %202 : vector<16x32xf32>
    %cst_86 = arith.constant dense<0.000000e+00> : vector<16xf32>
    %204 = vector.multi_reduction <add>, %203, %cst_86 [1] : vector<16x32xf32> to vector<16xf32>
    %205 = vector.shape_cast %204 : vector<16xf32> to vector<16x1xf32>
    %cst_87 = arith.constant 3.200000e+01 : f32
    %206 = vector.broadcast %cst_87 : f32 to vector<16x1xf32>
    %207 = arith.divf %205, %206 : vector<16x1xf32>
    %208 = vector.broadcast %200 : vector<16x1xf32> to vector<16x32xf32>
    %209 = arith.subf %192, %208 : vector<16x32xf32>
    %cst_88 = arith.constant 9.99999974E-6 : f32
    %210 = vector.broadcast %cst_88 : f32 to vector<16x1xf32>
    %211 = arith.addf %207, %210 : vector<16x1xf32>
    %212 = math.rsqrt %211 : vector<16x1xf32>
    %213 = vector.broadcast %212 : vector<16x1xf32> to vector<16x32xf32>
    %214 = arith.mulf %209, %213 : vector<16x32xf32>
    %215 = vector.broadcast %194 : vector<1x32xf32> to vector<16x32xf32>
    %216 = arith.mulf %214, %215 : vector<16x32xf32>
    %217 = vector.broadcast %196 : vector<1x32xf32> to vector<16x32xf32>
    %218 = arith.addf %216, %217 : vector<16x32xf32>
    %219 = arith.truncf %218 : vector<16x32xf32> to vector<16x32xbf16>
    %c1_89 = arith.constant 1 : index
    %c0_90 = arith.constant 0 : index
    %c0_91 = arith.constant 0 : index
    %220 = vector.load %arg6[%c1_89, %c0_90, %c0_91] : memref<2x32x96xbf16, #tpu.memory_space<vmem>>, vector<1x32x96xbf16>
    %221 = vector.shape_cast %220 : vector<1x32x96xbf16> to vector<32x96xbf16>
    %cst_92 = arith.constant dense<0.000000e+00> : vector<16x96xf32>
    %222 = tpu.matmul %219, %221, %cst_92 {dimension_numbers = #tpu.dot_dimension_numbers<[1], [0], [0], [1], [0, 0, 1, 1], [], []>} : vector<16x32xbf16>, vector<32x96xbf16>, vector<16x96xf32> -> vector<16x96xf32>
    %c1_93 = arith.constant 1 : index
    %c0_94 = arith.constant 0 : index
    %c0_95 = arith.constant 0 : index
    %223 = vector.load %arg7[%c1_93, %c0_94, %c0_95] : memref<2x1x96xf32, #tpu.memory_space<vmem>>, vector<1x1x96xf32>
    %224 = vector.shape_cast %223 : vector<1x1x96xf32> to vector<1x96xf32>
    %225 = vector.broadcast %224 : vector<1x96xf32> to vector<16x96xf32>
    %226 = arith.addf %222, %225 : vector<16x96xf32>
    %227 = vector.extract_strided_slice %226 {offsets = [0, 0], sizes = [16, 32], strides = [1, 1]} : vector<16x96xf32> to vector<16x32xf32>
    %228 = vector.shape_cast %227 : vector<16x32xf32> to vector<2x8x32xf32>
    %229 = vector.extract_strided_slice %226 {offsets = [0, 32], sizes = [16, 32], strides = [1, 1]} : vector<16x96xf32> to vector<16x32xf32>
    %230 = vector.shape_cast %229 : vector<16x32xf32> to vector<2x8x32xf32>
    %231 = vector.extract_strided_slice %226 {offsets = [0, 64], sizes = [16, 32], strides = [1, 1]} : vector<16x96xf32> to vector<16x32xf32>
    %232 = vector.shape_cast %231 : vector<16x32xf32> to vector<2x8x32xf32>
    %233 = vector.extract_strided_slice %228 {offsets = [0, 0, 0], sizes = [2, 8, 8], strides = [1, 1, 1]} : vector<2x8x32xf32> to vector<2x8x8xf32>
    %234 = vector.extract_strided_slice %230 {offsets = [0, 0, 0], sizes = [2, 8, 8], strides = [1, 1, 1]} : vector<2x8x32xf32> to vector<2x8x8xf32>
    "tpu.trace_start"() <{level = 10 : i32, message = "bid,bjd->bij"}> : () -> ()
    %cst_96 = arith.constant dense<0.000000e+00> : vector<2x8x8xf32>
    %235 = tpu.matmul %233, %234, %cst_96 {dimension_numbers = #tpu.dot_dimension_numbers<[2], [2], [1], [1], [0, 0, 0, 1, 1, 1], [0], [0]>} : vector<2x8x8xf32>, vector<2x8x8xf32>, vector<2x8x8xf32> -> vector<2x8x8xf32>
    "tpu.trace_stop"() : () -> ()
    %236 = arith.addf %235, %26 : vector<2x8x8xf32>
    %cst_97 = arith.constant dense<0xFF800000> : vector<2x8xf32>
    %237 = vector.multi_reduction <maximumf>, %236, %cst_97 [2] : vector<2x8x8xf32> to vector<2x8xf32>
    %238 = vector.shape_cast %237 : vector<2x8xf32> to vector<2x8x1xf32>
    %239 = vector.broadcast %238 : vector<2x8x1xf32> to vector<2x8x8xf32>
    %240 = arith.subf %236, %239 : vector<2x8x8xf32>
    %241 = math.exp %240 : vector<2x8x8xf32>
    %cst_98 = arith.constant dense<0.000000e+00> : vector<2x8xf32>
    %242 = vector.multi_reduction <add>, %241, %cst_98 [2] : vector<2x8x8xf32> to vector<2x8xf32>
    %243 = vector.shape_cast %242 : vector<2x8xf32> to vector<2x8x1xf32>
    %244 = tpu.reciprocal %243 {approx = true} : vector<2x8x1xf32> -> vector<2x8x1xf32>
    %245 = vector.broadcast %244 : vector<2x8x1xf32> to vector<2x8x8xf32>
    %246 = arith.mulf %241, %245 : vector<2x8x8xf32>
    %247 = vector.extract_strided_slice %232 {offsets = [0, 0, 0], sizes = [2, 8, 8], strides = [1, 1, 1]} : vector<2x8x32xf32> to vector<2x8x8xf32>
    "tpu.trace_start"() <{level = 10 : i32, message = "bij,bjd->bid"}> : () -> ()
    %cst_99 = arith.constant dense<0.000000e+00> : vector<2x8x8xf32>
    %248 = tpu.matmul %246, %247, %cst_99 {dimension_numbers = #tpu.dot_dimension_numbers<[2], [1], [1], [2], [0, 0, 0, 1, 1, 2], [0], [0]>} : vector<2x8x8xf32>, vector<2x8x8xf32>, vector<2x8x8xf32> -> vector<2x8x8xf32>
    "tpu.trace_stop"() : () -> ()
    %249 = vector.extract_strided_slice %228 {offsets = [0, 0, 8], sizes = [2, 8, 8], strides = [1, 1, 1]} : vector<2x8x32xf32> to vector<2x8x8xf32>
    %250 = vector.extract_strided_slice %230 {offsets = [0, 0, 8], sizes = [2, 8, 8], strides = [1, 1, 1]} : vector<2x8x32xf32> to vector<2x8x8xf32>
    "tpu.trace_start"() <{level = 10 : i32, message = "bid,bjd->bij"}> : () -> ()
    %cst_100 = arith.constant dense<0.000000e+00> : vector<2x8x8xf32>
    %251 = tpu.matmul %249, %250, %cst_100 {dimension_numbers = #tpu.dot_dimension_numbers<[2], [2], [1], [1], [0, 0, 0, 1, 1, 1], [0], [0]>} : vector<2x8x8xf32>, vector<2x8x8xf32>, vector<2x8x8xf32> -> vector<2x8x8xf32>
    "tpu.trace_stop"() : () -> ()
    %252 = arith.addf %251, %26 : vector<2x8x8xf32>
    %cst_101 = arith.constant dense<0xFF800000> : vector<2x8xf32>
    %253 = vector.multi_reduction <maximumf>, %252, %cst_101 [2] : vector<2x8x8xf32> to vector<2x8xf32>
    %254 = vector.shape_cast %253 : vector<2x8xf32> to vector<2x8x1xf32>
    %255 = vector.broadcast %254 : vector<2x8x1xf32> to vector<2x8x8xf32>
    %256 = arith.subf %252, %255 : vector<2x8x8xf32>
    %257 = math.exp %256 : vector<2x8x8xf32>
    %cst_102 = arith.constant dense<0.000000e+00> : vector<2x8xf32>
    %258 = vector.multi_reduction <add>, %257, %cst_102 [2] : vector<2x8x8xf32> to vector<2x8xf32>
    %259 = vector.shape_cast %258 : vector<2x8xf32> to vector<2x8x1xf32>
    %260 = tpu.reciprocal %259 {approx = true} : vector<2x8x1xf32> -> vector<2x8x1xf32>
    %261 = vector.broadcast %260 : vector<2x8x1xf32> to vector<2x8x8xf32>
    %262 = arith.mulf %257, %261 : vector<2x8x8xf32>
    %263 = vector.extract_strided_slice %232 {offsets = [0, 0, 8], sizes = [2, 8, 8], strides = [1, 1, 1]} : vector<2x8x32xf32> to vector<2x8x8xf32>
    "tpu.trace_start"() <{level = 10 : i32, message = "bij,bjd->bid"}> : () -> ()
    %cst_103 = arith.constant dense<0.000000e+00> : vector<2x8x8xf32>
    %264 = tpu.matmul %262, %263, %cst_103 {dimension_numbers = #tpu.dot_dimension_numbers<[2], [1], [1], [2], [0, 0, 0, 1, 1, 2], [0], [0]>} : vector<2x8x8xf32>, vector<2x8x8xf32>, vector<2x8x8xf32> -> vector<2x8x8xf32>
    "tpu.trace_stop"() : () -> ()
    %265 = vector.extract_strided_slice %228 {offsets = [0, 0, 16], sizes = [2, 8, 8], strides = [1, 1, 1]} : vector<2x8x32xf32> to vector<2x8x8xf32>
    %266 = vector.extract_strided_slice %230 {offsets = [0, 0, 16], sizes = [2, 8, 8], strides = [1, 1, 1]} : vector<2x8x32xf32> to vector<2x8x8xf32>
    "tpu.trace_start"() <{level = 10 : i32, message = "bid,bjd->bij"}> : () -> ()
    %cst_104 = arith.constant dense<0.000000e+00> : vector<2x8x8xf32>
    %267 = tpu.matmul %265, %266, %cst_104 {dimension_numbers = #tpu.dot_dimension_numbers<[2], [2], [1], [1], [0, 0, 0, 1, 1, 1], [0], [0]>} : vector<2x8x8xf32>, vector<2x8x8xf32>, vector<2x8x8xf32> -> vector<2x8x8xf32>
    "tpu.trace_stop"() : () -> ()
    %268 = arith.addf %267, %26 : vector<2x8x8xf32>
    %cst_105 = arith.constant dense<0xFF800000> : vector<2x8xf32>
    %269 = vector.multi_reduction <maximumf>, %268, %cst_105 [2] : vector<2x8x8xf32> to vector<2x8xf32>
    %270 = vector.shape_cast %269 : vector<2x8xf32> to vector<2x8x1xf32>
    %271 = vector.broadcast %270 : vector<2x8x1xf32> to vector<2x8x8xf32>
    %272 = arith.subf %268, %271 : vector<2x8x8xf32>
    %273 = math.exp %272 : vector<2x8x8xf32>
    %cst_106 = arith.constant dense<0.000000e+00> : vector<2x8xf32>
    %274 = vector.multi_reduction <add>, %273, %cst_106 [2] : vector<2x8x8xf32> to vector<2x8xf32>
    %275 = vector.shape_cast %274 : vector<2x8xf32> to vector<2x8x1xf32>
    %276 = tpu.reciprocal %275 {approx = true} : vector<2x8x1xf32> -> vector<2x8x1xf32>
    %277 = vector.broadcast %276 : vector<2x8x1xf32> to vector<2x8x8xf32>
    %278 = arith.mulf %273, %277 : vector<2x8x8xf32>
    %279 = vector.extract_strided_slice %232 {offsets = [0, 0, 16], sizes = [2, 8, 8], strides = [1, 1, 1]} : vector<2x8x32xf32> to vector<2x8x8xf32>
    "tpu.trace_start"() <{level = 10 : i32, message = "bij,bjd->bid"}> : () -> ()
    %cst_107 = arith.constant dense<0.000000e+00> : vector<2x8x8xf32>
    %280 = tpu.matmul %278, %279, %cst_107 {dimension_numbers = #tpu.dot_dimension_numbers<[2], [1], [1], [2], [0, 0, 0, 1, 1, 2], [0], [0]>} : vector<2x8x8xf32>, vector<2x8x8xf32>, vector<2x8x8xf32> -> vector<2x8x8xf32>
    "tpu.trace_stop"() : () -> ()
    %281 = vector.extract_strided_slice %228 {offsets = [0, 0, 24], sizes = [2, 8, 8], strides = [1, 1, 1]} : vector<2x8x32xf32> to vector<2x8x8xf32>
    %282 = vector.extract_strided_slice %230 {offsets = [0, 0, 24], sizes = [2, 8, 8], strides = [1, 1, 1]} : vector<2x8x32xf32> to vector<2x8x8xf32>
    "tpu.trace_start"() <{level = 10 : i32, message = "bid,bjd->bij"}> : () -> ()
    %cst_108 = arith.constant dense<0.000000e+00> : vector<2x8x8xf32>
    %283 = tpu.matmul %281, %282, %cst_108 {dimension_numbers = #tpu.dot_dimension_numbers<[2], [2], [1], [1], [0, 0, 0, 1, 1, 1], [0], [0]>} : vector<2x8x8xf32>, vector<2x8x8xf32>, vector<2x8x8xf32> -> vector<2x8x8xf32>
    "tpu.trace_stop"() : () -> ()
    %284 = arith.addf %283, %26 : vector<2x8x8xf32>
    %cst_109 = arith.constant dense<0xFF800000> : vector<2x8xf32>
    %285 = vector.multi_reduction <maximumf>, %284, %cst_109 [2] : vector<2x8x8xf32> to vector<2x8xf32>
    %286 = vector.shape_cast %285 : vector<2x8xf32> to vector<2x8x1xf32>
    %287 = vector.broadcast %286 : vector<2x8x1xf32> to vector<2x8x8xf32>
    %288 = arith.subf %284, %287 : vector<2x8x8xf32>
    %289 = math.exp %288 : vector<2x8x8xf32>
    %cst_110 = arith.constant dense<0.000000e+00> : vector<2x8xf32>
    %290 = vector.multi_reduction <add>, %289, %cst_110 [2] : vector<2x8x8xf32> to vector<2x8xf32>
    %291 = vector.shape_cast %290 : vector<2x8xf32> to vector<2x8x1xf32>
    %292 = tpu.reciprocal %291 {approx = true} : vector<2x8x1xf32> -> vector<2x8x1xf32>
    %293 = vector.broadcast %292 : vector<2x8x1xf32> to vector<2x8x8xf32>
    %294 = arith.mulf %289, %293 : vector<2x8x8xf32>
    %295 = vector.extract_strided_slice %232 {offsets = [0, 0, 24], sizes = [2, 8, 8], strides = [1, 1, 1]} : vector<2x8x32xf32> to vector<2x8x8xf32>
    "tpu.trace_start"() <{level = 10 : i32, message = "bij,bjd->bid"}> : () -> ()
    %cst_111 = arith.constant dense<0.000000e+00> : vector<2x8x8xf32>
    %296 = tpu.matmul %294, %295, %cst_111 {dimension_numbers = #tpu.dot_dimension_numbers<[2], [1], [1], [2], [0, 0, 0, 1, 1, 2], [0], [0]>} : vector<2x8x8xf32>, vector<2x8x8xf32>, vector<2x8x8xf32> -> vector<2x8x8xf32>
    "tpu.trace_stop"() : () -> ()
    %297 = tpu.concatenate %248, %264, %280, %296 in 2 : vector<2x8x8xf32>, vector<2x8x8xf32>, vector<2x8x8xf32>, vector<2x8x8xf32> -> vector<2x8x32xf32>
    %298 = vector.shape_cast %297 : vector<2x8x32xf32> to vector<16x32xf32>
    %299 = arith.truncf %298 : vector<16x32xf32> to vector<16x32xbf16>
    %c1_112 = arith.constant 1 : index
    %c0_113 = arith.constant 0 : index
    %c0_114 = arith.constant 0 : index
    %300 = vector.load %arg8[%c1_112, %c0_113, %c0_114] : memref<2x32x32xbf16, #tpu.memory_space<vmem>>, vector<1x32x32xbf16>
    %301 = vector.shape_cast %300 : vector<1x32x32xbf16> to vector<32x32xbf16>
    %cst_115 = arith.constant dense<0.000000e+00> : vector<16x32xf32>
    %302 = tpu.matmul %299, %301, %cst_115 {dimension_numbers = #tpu.dot_dimension_numbers<[1], [0], [0], [1], [0, 0, 1, 1], [], []>} : vector<16x32xbf16>, vector<32x32xbf16>, vector<16x32xf32> -> vector<16x32xf32>
    %303 = arith.addf %192, %302 : vector<16x32xf32>
    %c1_116 = arith.constant 1 : index
    %c0_117 = arith.constant 0 : index
    %c0_118 = arith.constant 0 : index
    %304 = vector.load %arg9[%c1_116, %c0_117, %c0_118] : memref<2x1x32xf32, #tpu.memory_space<vmem>>, vector<1x1x32xf32>
    %305 = vector.shape_cast %304 : vector<1x1x32xf32> to vector<1x32xf32>
    %306 = vector.broadcast %305 : vector<1x32xf32> to vector<16x32xf32>
    %307 = arith.addf %303, %306 : vector<16x32xf32>
    %c1_119 = arith.constant 1 : index
    %c0_120 = arith.constant 0 : index
    %c0_121 = arith.constant 0 : index
    %308 = vector.load %arg10[%c1_119, %c0_120, %c0_121] : memref<2x1x32xf32, #tpu.memory_space<vmem>>, vector<1x1x32xf32>
    %309 = vector.shape_cast %308 : vector<1x1x32xf32> to vector<1x32xf32>
    %c1_122 = arith.constant 1 : index
    %c0_123 = arith.constant 0 : index
    %c0_124 = arith.constant 0 : index
    %310 = vector.load %arg11[%c1_122, %c0_123, %c0_124] : memref<2x1x32xf32, #tpu.memory_space<vmem>>, vector<1x1x32xf32>
    %311 = vector.shape_cast %310 : vector<1x1x32xf32> to vector<1x32xf32>
    %cst_125 = arith.constant dense<0.000000e+00> : vector<16xf32>
    %312 = vector.multi_reduction <add>, %307, %cst_125 [1] : vector<16x32xf32> to vector<16xf32>
    %313 = vector.shape_cast %312 : vector<16xf32> to vector<16x1xf32>
    %cst_126 = arith.constant 3.200000e+01 : f32
    %314 = vector.broadcast %cst_126 : f32 to vector<16x1xf32>
    %315 = arith.divf %313, %314 : vector<16x1xf32>
    %316 = vector.broadcast %315 : vector<16x1xf32> to vector<16x32xf32>
    %317 = arith.subf %307, %316 : vector<16x32xf32>
    %318 = arith.mulf %317, %317 : vector<16x32xf32>
    %cst_127 = arith.constant dense<0.000000e+00> : vector<16xf32>
    %319 = vector.multi_reduction <add>, %318, %cst_127 [1] : vector<16x32xf32> to vector<16xf32>
    %320 = vector.shape_cast %319 : vector<16xf32> to vector<16x1xf32>
    %cst_128 = arith.constant 3.200000e+01 : f32
    %321 = vector.broadcast %cst_128 : f32 to vector<16x1xf32>
    %322 = arith.divf %320, %321 : vector<16x1xf32>
    %323 = vector.broadcast %315 : vector<16x1xf32> to vector<16x32xf32>
    %324 = arith.subf %307, %323 : vector<16x32xf32>
    %cst_129 = arith.constant 9.99999974E-6 : f32
    %325 = vector.broadcast %cst_129 : f32 to vector<16x1xf32>
    %326 = arith.addf %322, %325 : vector<16x1xf32>
    %327 = math.rsqrt %326 : vector<16x1xf32>
    %328 = vector.broadcast %327 : vector<16x1xf32> to vector<16x32xf32>
    %329 = arith.mulf %324, %328 : vector<16x32xf32>
    %330 = vector.broadcast %309 : vector<1x32xf32> to vector<16x32xf32>
    %331 = arith.mulf %329, %330 : vector<16x32xf32>
    %332 = vector.broadcast %311 : vector<1x32xf32> to vector<16x32xf32>
    %333 = arith.addf %331, %332 : vector<16x32xf32>
    %334 = arith.truncf %333 : vector<16x32xf32> to vector<16x32xbf16>
    %c1_130 = arith.constant 1 : index
    %c0_131 = arith.constant 0 : index
    %c0_132 = arith.constant 0 : index
    %335 = vector.load %arg12[%c1_130, %c0_131, %c0_132] : memref<2x32x128xbf16, #tpu.memory_space<vmem>>, vector<1x32x128xbf16>
    %336 = vector.shape_cast %335 : vector<1x32x128xbf16> to vector<32x128xbf16>
    %cst_133 = arith.constant dense<0.000000e+00> : vector<16x128xf32>
    %337 = tpu.matmul %334, %336, %cst_133 {dimension_numbers = #tpu.dot_dimension_numbers<[1], [0], [0], [1], [0, 0, 1, 1], [], []>} : vector<16x32xbf16>, vector<32x128xbf16>, vector<16x128xf32> -> vector<16x128xf32>
    %c1_134 = arith.constant 1 : index
    %c0_135 = arith.constant 0 : index
    %c0_136 = arith.constant 0 : index
    %338 = vector.load %arg13[%c1_134, %c0_135, %c0_136] : memref<2x1x128xf32, #tpu.memory_space<vmem>>, vector<1x1x128xf32>
    %339 = vector.shape_cast %338 : vector<1x1x128xf32> to vector<1x128xf32>
    %340 = vector.broadcast %339 : vector<1x128xf32> to vector<16x128xf32>
    %341 = arith.addf %337, %340 : vector<16x128xf32>
    %cst_137 = arith.constant 1.702000e+00 : f32
    %342 = vector.broadcast %cst_137 : f32 to vector<16x128xf32>
    %343 = arith.mulf %342, %341 : vector<16x128xf32>
    %344 = arith.negf %343 : vector<16x128xf32>
    %345 = math.exp %344 : vector<16x128xf32>
    %cst_138 = arith.constant 1.000000e+00 : f32
    %346 = vector.broadcast %cst_138 : f32 to vector<16x128xf32>
    %347 = arith.addf %346, %345 : vector<16x128xf32>
    %348 = arith.divf %346, %347 : vector<16x128xf32>
    %349 = arith.mulf %341, %348 : vector<16x128xf32>
    %350 = arith.truncf %349 : vector<16x128xf32> to vector<16x128xbf16>
    %c1_139 = arith.constant 1 : index
    %c0_140 = arith.constant 0 : index
    %c0_141 = arith.constant 0 : index
    %351 = vector.load %arg14[%c1_139, %c0_140, %c0_141] : memref<2x128x32xbf16, #tpu.memory_space<vmem>>, vector<1x128x32xbf16>
    %352 = vector.shape_cast %351 : vector<1x128x32xbf16> to vector<128x32xbf16>
    %cst_142 = arith.constant dense<0.000000e+00> : vector<16x32xf32>
    %353 = tpu.matmul %350, %352, %cst_142 {dimension_numbers = #tpu.dot_dimension_numbers<[1], [0], [0], [1], [0, 0, 1, 1], [], []>} : vector<16x128xbf16>, vector<128x32xbf16>, vector<16x32xf32> -> vector<16x32xf32>
    %354 = arith.addf %307, %353 : vector<16x32xf32>
    %c1_143 = arith.constant 1 : index
    %c0_144 = arith.constant 0 : index
    %c0_145 = arith.constant 0 : index
    %355 = vector.load %arg15[%c1_143, %c0_144, %c0_145] : memref<2x1x32xf32, #tpu.memory_space<vmem>>, vector<1x1x32xf32>
    %356 = vector.shape_cast %355 : vector<1x1x32xf32> to vector<1x32xf32>
    %357 = vector.broadcast %356 : vector<1x32xf32> to vector<16x32xf32>
    %358 = arith.addf %354, %357 : vector<16x32xf32>
    %359 = tpu.iota {dimensions = array<i32: 1>} : vector<2x8xi32>
    %cst_146 = arith.constant dense<-2147483648> : vector<2xi32>
    %360 = vector.multi_reduction <maxsi>, %0, %cst_146 [1] : vector<2x8xi32> to vector<2xi32>
    %361 = vector.shape_cast %360 : vector<2xi32> to vector<2x1xi32>
    %362 = vector.broadcast %361 : vector<2x1xi32> to vector<2x8xi32>
    %363 = arith.cmpi eq, %0, %362 : vector<2x8xi32>
    %c8_i32 = arith.constant 8 : i32
    %364 = vector.broadcast %c8_i32 : i32 to vector<2x8xi32>
    %365 = arith.select %363, %359, %364 : vector<2x8xi1>, vector<2x8xi32>
    %cst_147 = arith.constant dense<2147483647> : vector<2xi32>
    %366 = vector.multi_reduction <minsi>, %365, %cst_147 [1] : vector<2x8xi32> to vector<2xi32>
    %367 = vector.shape_cast %366 : vector<2xi32> to vector<2x1xi32>
    %368 = vector.broadcast %367 : vector<2x1xi32> to vector<2x8xi32>
    %369 = arith.cmpi eq, %359, %368 : vector<2x8xi32>
    %370 = arith.extui %369 : vector<2x8xi1> to vector<2x8xi32>
    %371 = arith.sitofp %370 : vector<2x8xi32> to vector<2x8xf32>
    %372 = vector.shape_cast %371 : vector<2x8xf32> to vector<2x8x1xf32>
    %373 = vector.shape_cast %358 : vector<16x32xf32> to vector<2x8x32xf32>
    %374 = vector.broadcast %372 : vector<2x8x1xf32> to vector<2x8x32xf32>
    %375 = arith.mulf %374, %373 : vector<2x8x32xf32>
    %cst_148 = arith.constant dense<0.000000e+00> : vector<2x32xf32>
    %376 = vector.multi_reduction <add>, %375, %cst_148 [1] : vector<2x8x32xf32> to vector<2x32xf32>
    %c0_149 = arith.constant 0 : index
    %c0_150 = arith.constant 0 : index
    %377 = vector.load %arg16[%c0_149, %c0_150] : memref<1x32xf32, #tpu.memory_space<vmem>>, vector<1x32xf32>
    %c0_151 = arith.constant 0 : index
    %c0_152 = arith.constant 0 : index
    %378 = vector.load %arg17[%c0_151, %c0_152] : memref<1x32xf32, #tpu.memory_space<vmem>>, vector<1x32xf32>
    %cst_153 = arith.constant dense<0.000000e+00> : vector<2xf32>
    %379 = vector.multi_reduction <add>, %376, %cst_153 [1] : vector<2x32xf32> to vector<2xf32>
    %380 = vector.shape_cast %379 : vector<2xf32> to vector<2x1xf32>
    %cst_154 = arith.constant 3.200000e+01 : f32
    %381 = vector.broadcast %cst_154 : f32 to vector<2x1xf32>
    %382 = arith.divf %380, %381 : vector<2x1xf32>
    %383 = vector.broadcast %382 : vector<2x1xf32> to vector<2x32xf32>
    %384 = arith.subf %376, %383 : vector<2x32xf32>
    %385 = arith.mulf %384, %384 : vector<2x32xf32>
    %cst_155 = arith.constant dense<0.000000e+00> : vector<2xf32>
    %386 = vector.multi_reduction <add>, %385, %cst_155 [1] : vector<2x32xf32> to vector<2xf32>
    %387 = vector.shape_cast %386 : vector<2xf32> to vector<2x1xf32>
    %cst_156 = arith.constant 3.200000e+01 : f32
    %388 = vector.broadcast %cst_156 : f32 to vector<2x1xf32>
    %389 = arith.divf %387, %388 : vector<2x1xf32>
    %390 = vector.broadcast %382 : vector<2x1xf32> to vector<2x32xf32>
    %391 = arith.subf %376, %390 : vector<2x32xf32>
    %cst_157 = arith.constant 9.99999974E-6 : f32
    %392 = vector.broadcast %cst_157 : f32 to vector<2x1xf32>
    %393 = arith.addf %389, %392 : vector<2x1xf32>
    %394 = math.rsqrt %393 : vector<2x1xf32>
    %395 = vector.broadcast %394 : vector<2x1xf32> to vector<2x32xf32>
    %396 = arith.mulf %391, %395 : vector<2x32xf32>
    %397 = vector.broadcast %377 : vector<1x32xf32> to vector<2x32xf32>
    %398 = arith.mulf %396, %397 : vector<2x32xf32>
    %399 = vector.broadcast %378 : vector<1x32xf32> to vector<2x32xf32>
    %400 = arith.addf %398, %399 : vector<2x32xf32>
    %c0_158 = arith.constant 0 : index
    %c0_159 = arith.constant 0 : index
    %401 = vector.load %arg18[%c0_158, %c0_159] : memref<32x16xf32, #tpu.memory_space<vmem>>, vector<32x16xf32>
    %cst_160 = arith.constant dense<0.000000e+00> : vector<2x16xf32>
    %402 = tpu.matmul %400, %401, %cst_160 {dimension_numbers = #tpu.dot_dimension_numbers<[1], [0], [0], [1], [0, 0, 1, 1], [], []>} : vector<2x32xf32>, vector<32x16xf32>, vector<2x16xf32> -> vector<2x16xf32>
    %c0_161 = arith.constant 0 : index
    %c0_162 = arith.constant 0 : index
    %403 = vector.load %arg19[%c0_161, %c0_162] : memref<2x16xf32, #tpu.memory_space<vmem>>, vector<2x16xf32>
    tpu.vector_store %arg19[%c0_161, %c0_162], %402 {strides = array<i32>} : memref<2x16xf32, #tpu.memory_space<vmem>>, vector<2x16xf32>,
    return
  }
}

</mosaic_0001>

<bundles_post_ra>
// kernel: tpu_custom_call.1
= control target key start
LH: loop header
LB: loop body
LE: loop exit
PB: predicated region body
PF: predicated region fallthrough
CT: control target
= control target key end

     0   :  { %s5546_s0 = inlined_call_operand.vmem [shape: s32[2,8], index: 0, kind: input, shape index: {}]   ;;  %s5547_s1 = inlined_call_operand.vmem [shape: s32[2,8], index: 1, kind: input, shape index: {}]   ;;  %s5548_s2 = inlined_call_operand.vmem [shape: bf16[64,32], index: 2, kind: input, shape index: {}]   ;;  %s5549_s3 = inlined_call_operand.vmem [shape: f32[8,32], index: 3, kind: input, shape index: {}]   ;;  %s5550_s4 = inlined_call_operand.vmem [shape: f32[2,1,32], index: 4, kind: input, shape index: {}]   ;;  %s5551_s5 = inlined_call_operand.vmem [shape: f32[2,1,32], index: 5, kind: input, shape index: {}]   ;;  %s5552_s6 = inlined_call_operand.vmem [shape: bf16[2,32,96], index: 6, kind: input, shape index: {}]   ;;  %s5553_s7 = inlined_call_operand.vmem [shape: f32[2,1,96], index: 7, kind: input, shape index: {}]   ;;  %s5554_s8 = inlined_call_operand.vmem [shape: bf16[2,32,32], index: 8, kind: input, shape index: {}]   ;;  %s5555_s9 = inlined_call_operand.vmem [shape: f32[2,1,32], index: 9, kind: input, shape index: {}]   ;;  %s5556_s10 = inlined_call_operand.vmem [shape: f32[2,1,32], index: 10, kind: input, shape index: {}]   ;;  %s5557_s11 = inlined_call_operand.vmem [shape: f32[2,1,32], index: 11, kind: input, shape index: {}]   ;;  %s5558_s12 = inlined_call_operand.vmem [shape: bf16[2,32,128], index: 12, kind: input, shape index: {}]   ;;  %s5559_s13 = inlined_call_operand.vmem [shape: f32[2,1,128], index: 13, kind: input, shape index: {}]   ;;  %s5560_s14 = inlined_call_operand.vmem [shape: bf16[2,128,32], index: 14, kind: input, shape index: {}]   ;;  %s5561_s15 = inlined_call_operand.vmem [shape: f32[2,1,32], index: 15, kind: input, shape index: {}]   ;;  %s5562_s16 = inlined_call_operand.vmem [shape: f32[1,32], index: 16, kind: input, shape index: {}]   ;;  %s5563_s17 = inlined_call_operand.vmem [shape: f32[1,32], index: 17, kind: input, shape index: {}]   ;;  %s5564_s18 = inlined_call_operand.vmem [shape: f32[32,16], index: 18, kind: input, shape index: {}]   ;;  %s5565_s19 = inlined_call_operand.hbm [shape: f32[2,16], index: 19, kind: output, shape index: {}]  }
   0x1   :  { %5579 = sst [smem:[#allocation5_spill]] %s5546_s0 }
   0x2   :  { %5580 = sst [smem:[#allocation6_spill]] %s5547_s1 }
   0x3   :  { %5581 = sst [smem:[#allocation7_spill]] %s5548_s2 }
   0x4   :  { %5582 = sst [smem:[#allocation8_spill]] %s5549_s3 }
   0x5   :  { %v66_v0 = vlaneseq  ;;  %v4743_v2 = vmov 0.0   ;;  %s5583_s20 = sld [smem:[#allocation7_spill]]  ;;  %s5584_s22 = sld [smem:[#allocation5_spill]]  ;;  %vm4744_vm0 = vmmov 0  }
   0x6   :  { %4260 = vmatprep.subr.bf16.mxu1 %v4743_v2  ;;  %4280 = vmatprep.subr.mxu0 %v4743_v2 }
   0x7   :  { %v4864_v1 = vshrl.u32 %v66_v0, 7  ;;  %4268 = vmatprep.mubr.msk.bf16.mxu1 %vm4744_vm0, %v4743_v2  ;;  %4282 = vmatprep.mubr.msk.f32.mxu0 %vm4744_vm0, %v4743_v2 }
   0x9   :  { %v4875_v5 = vsub.s32 0, %v4864_v1  ;;  %v77_v6 = vsub.s32 1, %v4864_v1 }
   0xb   :  { %v4588_v3 = vld [vmem:[%s5583_s20] sm:$0xff]   ;;  %v4589_v7 = vld [vmem:[%s5583_s20 + $0x8] sm:$0xff]   ;;  %v4590_v10 = vld [vmem:[%s5583_s20 + $0x10] sm:$0xff]  }
   0xc   :  { %v64_v4 = vld [vmem:[%s5584_s22] sm:$0x3]  ;;  %4261 = vmatpush3.bf16.msra.mxu1 %v4588_v3  ;;  %v4591_v11 = vld [vmem:[%s5583_s20 + $0x18] sm:$0xff]  }
   0xd   :  { %4262 = vmatprep.subr.bf16.mxu1 %v4743_v2  ;;  %v71_v8 = vrot.slane %v64_v4, %v4875_v5  ;;  %v78_v9 = vrot.slane %v64_v4, %v77_v6 }
   0xf   :  { %73 = vbcast.lane.b32.xlu0 %v71_v8, 256 }
  0x10   :  { %4263 = vmatpush3.bf16.msra.mxu1 %v4589_v7 }
  0x11   :  { %4264 = vmatprep.subr.bf16.mxu1 %v4743_v2 }
  0x13   :  { %80 = vbcast.lane.b32.xlu0 %v78_v9, 256 }
  0x14   :  { %4265 = vmatpush3.bf16.msra.mxu1 %v4590_v10 }
  0x15   :  { %4266 = vmatprep.subr.bf16.mxu1 %v4743_v2 }
  0x18   :  { %4267 = vmatpush3.bf16.msra.mxu1 %v4591_v11 }
  0x19   :  { %4272 = vmatprep.subr.bf16.mxu1 %v4743_v2 }
  0x1a   :  { %24 = vsyncpa [#allocation3], 0  ;;  %v4898_v12 = vand.u32 127, %v66_v0  ;;  %vm126_vm3 = vcmask 523264   ;;  %s5585_s29 = sld [smem:[#allocation8_spill]]  ;;  %vm216_vm4 = vcmask 261120  }
  0x1b   :  { %v4592_v37 = vld [vmem:[%s5552_s6] sm:$0xff]   ;;  %v4593_v38 = vld [vmem:[%s5552_s6 + $0x8] sm:$0xff]   ;;  %s4745_s26 = smov 96   ;;  %vm331_vm5 = vcmask 64512   ;;  %v4746_v3 = vmov 1966171168  }
  0x1c   :  { %v4007_v47 = vld [vmem:[%s5550_s4] ss:$0 sm:$0xff]  ;;  %v182_v4 = vunpack.c.l.s4 %v4746_v3  ;;  %vm197_vm9 = vcmp.le.s32.totalorder %v4898_v12, %v4864_v1  ;;  %s4749_s0 = smov 64   ;;  %s4750_s30 = smov 88   ;;  %vm1673_vm13 = vcmask 130048   ;;  %vm1676_vm14 = vcmask 195584  }
  0x1d   :  { %v4008_v51 = vld [vmem:[%s5551_s5] ss:$0 sm:$0xff]  ;;  %s4751_s20 = smov 120   ;;  %s4752_s21 = smov 56   ;;  %vm3785_vm15 = vcmask 58368  }
  0x1e   :  { %v4009_v56 = vld [vmem:[%s5553_s7] ss:$0 sm:$0xff]  ;;  %v183_v7 = vunpack.c.0.s8 %v182_v4  ;;  %s4753_s1 = smov 80   ;;  %s4754_s2 = smov 112  }
  0x1f   :  { %s5577_s23 = smov 48   ;;  %s5575_s24 = smov 72  }
  0x20   :  { %v96_v18 = vld [vmem:[%s5585_s29] sm:$0xff]  ;;  %v186_v8 = vsub.s32 %v183_v7, %v4864_v1  ;;  %s5586_s29 = sld [smem:[#allocation6_spill]]  ;;  %s5572_s25 = smov 104  }
  0x21   :  { %s5570_s3 = smov 40   ;;  %s5569_s27 = smov 8  }
  0x22   :  { %s5568_s28 = smov 16  }
  0x26   :  { %v4006_v9 = vld.sshfl [vmem:[%s5586_s29] sm:$0x11 pattern:$0x75316420] }
  0x27   :  { %v180_v10 = vcombine.high %v4006_v9, %v4006_v9  ;;  %v187_v11 = vrot.slane %v4006_v9, %v186_v8 }
  0x29   :  { %vm195_vm6 = vcmp.gt.s32.totalorder %v187_v11, 0 }
  0x81   :  { %v74_v13 = vpop.permute.xlu0 %73 }
  0x82   :  { %vm82_vm1 = vcmp.eq.s32.totalorder %v4898_v12, %v74_v13  ;;  %v194_v13 = vrot.slane %v180_v10, %v186_v8 }
  0x83   :  { %v84_v15 = vsel %vm82_vm1, 1.0, %v4743_v2 }
  0x84   :  { %vm196_vm7 = vcmp.gt.s32.totalorder %v194_v13, 0 }
  0x85   :  { %v81_v14 = vpop.permute.xlu0 %80 }
  0x86   :  { %vm83_vm2 = vcmp.eq.s32.totalorder %v4898_v12, %v81_v14  ;;  %v4747_v14 = vmov 0  }
  0x87   :  { %v85_v16 = vsel %vm83_vm2, 1.0, %v4743_v2 }
  0x88   :  { %v4149_v17 = vpack.c.bf16 %v85_v16, %v84_v15  ;;  %v198_v15 = vsel %vm195_vm6, 1, %v4747_v14  ;;  %vm3858_vm6 = vcmask 254976  }
  0x89   :  { %v203_v16 = vrot.slane %v198_v15, %v4875_v5 }
  0x8a   :  { %4269 = vmatmul.mubr.msk.bf16.vlgmr.msra.gmra.mrb[0].mxu1 %vm126_vm3, %v4149_v17  ;;  %v199_v17 = vsel %vm196_vm7, 1, %v4747_v14  ;;  %vm3984_vm7 = vcmask 123904  }
  0x8b   :  { %4276 = vmatprep.mubr.msk.bf16.mxu1 %vm4744_vm0, %v4743_v2  ;;  %4273 = vmatpush3.bf16.msra.mxu1 %v4592_v37  ;;  %vm208_vm8 = vcmp.eq.s32.totalorder %v203_v16, 1 }
  0x8c   :  { %4274 = vmatprep.subr.bf16.mxu1 %v4743_v2  ;;  %vm210_vm10 = vmand %vm197_vm9, %vm208_vm8 }
  0x8f   :  { %4275 = vmatpush3.bf16.msra.mxu1 %v4593_v38 }
  0x90   :  { %4285 = vmatprep.subr.mxu1 %v4743_v2 }
 0x15d   :  { %v164_v19 = vpop.f32.mrb[0].mxu1 }
 0x15e   :  { %v4909_v20 = vadd.f32 %v164_v19, %v96_v18  ;;  %v4270_v21 = vpop.f32.mrb[1].mxu1  ;;  %v4748_v19 = vmov -1e+09  }
 0x15f   :  { %v167_v22 = vpop.f32.mrb[2].mxu1  ;;  %v4969_v21 = vsel %vm210_vm10, 0.0, %v4748_v19 }
 0x160   :  { %v4911_v23 = vadd.f32 %v167_v22, %v96_v18  ;;  %v4271_v24 = vpop.f32.mrb[3].mxu1  ;;  %v217_v25 = vsel %vm216_vm4, %v4909_v20, 0.0  ;;  %v207_v18 = vrot.slane %v199_v17, %v4875_v5 }
 0x161   :  { %218 = vadd.xlane.f32.xlu1 %v217_v25 }
 0x162   :  { %v220_v26 = vsel %vm216_vm4, %v4911_v23, 0.0  ;;  %vm209_vm11 = vcmp.eq.s32.totalorder %v207_v18, 1 }
 0x163   :  { %vm211_vm12 = vmand %vm197_vm9, %vm209_vm11 }
 0x165   :  { %221 = vadd.xlane.f32.xlu1 %v220_v26  ;;  %v4972_v26 = vsel %vm211_vm12, 0.0, %v4748_v19 }
 0x1ee   :  { %v219_v27 = vpop.xlane.xlu1 %218 }
 0x1ef   :  { %v224_v28 = vmul.f32 0.03125, %v219_v27 }
 0x1f1   :  { %v226_v29 = vsub.f32 %v4909_v20, %v224_v28 }
 0x1f2   :  { %v222_v30 = vpop.xlane.xlu1 %221 }
 0x1f3   :  { %v225_v31 = vmul.f32 0.03125, %v222_v30  ;;  %v228_v32 = vmul.f32 %v226_v29, %v226_v29 }
 0x1f5   :  { %v227_v33 = vsub.f32 %v4911_v23, %v225_v31  ;;  %v230_v34 = vsel %vm216_vm4, %v228_v32, 0.0 }
 0x1f6   :  { %231 = vadd.xlane.f32.xlu0 %v230_v34 }
 0x1f7   :  { %v229_v35 = vmul.f32 %v227_v33, %v227_v33 }
 0x1f9   :  { %v233_v36 = vsel %vm216_vm4, %v229_v35, 0.0 }
 0x1fa   :  { %234 = vadd.xlane.f32.xlu1 %v233_v36 }
 0x283   :  { %v232_v39 = vpop.xlane.xlu0 %231 }
 0x284   :  { %v236_v40 = vmul.f32 0.03125, %v232_v39 }
 0x286   :  { %v238_v41 = vadd.f32 1e-05, %v236_v40 }
 0x287   :  { %v235_v42 = vpop.xlane.xlu1 %234 }
 0x288   :  { %4620 = vrsqrt.f32 %v238_v41  ;;  %v237_v43 = vmul.f32 0.03125, %v235_v42 }
 0x28a   :  { %v239_v44 = vadd.f32 1e-05, %v237_v43 }
 0x28c   :  { %4622 = vrsqrt.f32 %v239_v44 }
 0x292   :  { %v4621_v45 = vpop.eup %4620 }
 0x293   :  { %v242_v46 = vmul.f32 %v4621_v45, %v226_v29 }
 0x295   :  { %v250_v49 = vmul.f32 %v4007_v47, %v242_v46 }
 0x296   :  { %v4623_v48 = vpop.eup %4622 }
 0x297   :  { %v243_v50 = vmul.f32 %v4623_v48, %v227_v33  ;;  %v258_v53 = vadd.f32 %v4008_v51, %v250_v49 }
 0x299   :  { %v251_v52 = vmul.f32 %v4007_v47, %v243_v50 }
 0x29b   :  { %v259_v54 = vadd.f32 %v4008_v51, %v251_v52 }
 0x29d   :  { %v260_v55 = vpack.c.bf16 %v259_v54, %v258_v53 }
 0x29f   :  { %4277 = vmatmul.mubr.msk.bf16.vlgmr.msra.gmra.mrb[4].mxu1 %vm216_vm4, %v260_v55 }
 0x2a0   :  { %4287 = vmatprep.mubr.msk.f32.mxu1 %vm4744_vm0, %v4743_v2 }
 0x372   :  { %v321_v57 = vpop.f32.mrb[4].mxu1 }
 0x373   :  { %v4941_v58 = vadd.f32 %v4009_v56, %v321_v57  ;;  %v4278_v59 = vpop.f32.mrb[5].mxu1 }
 0x374   :  { %v324_v60 = vpop.f32.mrb[6].mxu1 }
 0x375   :  { %329 = vrot.lane.b32.xlu1 %v4941_v58, %s4745_s26  ;;  %v4279_v61 = vpop.f32.mrb[7].mxu1  ;;  %v4945_v62 = vadd.f32 %v4009_v56, %v324_v60 }
 0x379   :  { %407 = vrot.lane.b32.xlu1 %v4945_v62, %s4745_s26 }
 0x3e7   :  { %v330_v63 = vpop.permute.xlu1 %329 }
 0x3e8   :  { %4281 = vmatpush3.xpose.msk.msra.mxu0 %vm331_vm5, %v330_v63 }
 0x3e9   :  { %4290 = vmatprep.subr.mxu0 %v4743_v2 }
 0x3eb   :  { %4283 = vmatmul.mubr.msk.f32.vlgmr.msra.gmra.mrb[0].mxu0 %vm331_vm5, %v4941_v58  ;;  %v408_v0 = vpop.permute.xlu1 %407 }
 0x3ec   :  { %4286 = vmatpush3.xpose.msk.msra.mxu1 %vm331_vm5, %v408_v0  ;;  %4292 = vmatprep.mubr.msk.f32.mxu0 %vm4744_vm0, %v4743_v2 }
 0x3ed   :  { %4295 = vmatprep.subr.mxu1 %v4743_v2 }
 0x3ef   :  { %4288 = vmatmul.mubr.msk.f32.vlgmr.msra.gmra.mrb[8].mxu1 %vm331_vm5, %v4945_v62 }
 0x3f0   :  { %4297 = vmatprep.mubr.msk.f32.mxu1 %vm4744_vm0, %v4743_v2 }
 0x4be   :  { %v402_v22 = vpop.f32.mrb[0].mxu0 }
 0x4bf   :  { %v403_v24 = vadd.f32 %v402_v22, %v4969_v21  ;;  %v4284_v25 = vpop.f32.mrb[1].mxu0 }
 0x4c1   :  { %v483_v27 = vsel %vm331_vm5, %v403_v24, -inf }
 0x4c2   :  { %484 = vmax.xlane.f32.xlu1 %v483_v27  ;;  %v479_v28 = vpop.f32.mrb[8].mxu1 }
 0x4c3   :  { %v480_v29 = vadd.f32 %v479_v28, %v4972_v26  ;;  %v4289_v30 = vpop.f32.mrb[9].mxu1 }
 0x4c5   :  { %v486_v31 = vsel %vm331_vm5, %v480_v29, -inf }
 0x4c6   :  { %487 = vmax.xlane.f32.xlu0 %v486_v31 }
 0x4d3   :  { %581 = vrot.lane.b32.xlu1 %v4945_v62, %s4749_s0 }
 0x4dc   :  { %505 = vrot.lane.b32.xlu0 %v4941_v58, %s4749_s0 }
 0x4e0   :  { %659 = vrot.lane.b32.xlu0 %v4941_v58, %s4750_s30 }
 0x4e4   :  { %737 = vrot.lane.b32.xlu0 %v4945_v62, %s4750_s30 }
 0x4e8   :  { %657 = vrot.lane.b32.xlu0 %v4941_v58, %s4751_s20 }
 0x54f   :  { %v485_v32 = vpop.xlane.xlu1 %484 }
 0x550   :  { %v489_v33 = vsub.f32 %v403_v24, %v485_v32 }
 0x552   :  { %v491_v34 = vmul.f32 1.442695, %v489_v33 }
 0x553   :  { %v582_v35 = vpop.permute.xlu1 %581  ;;  %v488_v36 = vpop.xlane.xlu0 %487 }
 0x554   :  { %4624 = vpow2.f32 %v491_v34  ;;  %v490_v37 = vsub.f32 %v480_v29, %v488_v36  ;;  %4296 = vmatpush3.msra.mxu1 %v582_v35 }
 0x555   :  { %4305 = vmatprep.subr.mxu1 %v4743_v2 }
 0x556   :  { %v493_v38 = vmul.f32 1.442695, %v490_v37 }
 0x557   :  { %v506_v39 = vpop.permute.xlu0 %505 }
 0x558   :  { %4626 = vpow2.f32 %v493_v38  ;;  %4291 = vmatpush3.msra.mxu0 %v506_v39 }
 0x559   :  { %4300 = vmatprep.subr.mxu0 %v4743_v2 }
 0x55b   :  { %v660_v44 = vpop.permute.xlu0 %659 }
 0x55e   :  { %v4625_v40 = vpop.eup %4624 }
 0x55f   :  { %v495_v41 = vsel %vm331_vm5, %v4625_v40, 0.0  ;;  %v738_v45 = vpop.permute.xlu0 %737 }
 0x560   :  { %496 = vadd.xlane.f32.xlu0 %v495_v41 }
 0x562   :  { %v4627_v42 = vpop.eup %4626 }
 0x563   :  { %v498_v43 = vsel %vm331_vm5, %v4627_v42, 0.0  ;;  %v658_v46 = vpop.permute.xlu0 %657 }
 0x564   :  { %499 = vadd.xlane.f32.xlu0 %v498_v43 }
 0x57a   :  { %735 = vrot.lane.b32.xlu0 %v4945_v62, %s4751_s20 }
 0x5ed   :  { %v497_v47 = vpop.xlane.xlu0 %496 }
 0x5ee   :  { %4628 = vrcp.f32 %v497_v47 }
 0x5f1   :  { %v500_v48 = vpop.xlane.xlu0 %499 }
 0x5f2   :  { %4630 = vrcp.f32 %v500_v48 }
 0x5f5   :  { %v736_v53 = vpop.permute.xlu0 %735 }
 0x5f8   :  { %v4629_v49 = vpop.eup %4628 }
 0x5f9   :  { %v503_v50 = vmul.f32 %v4629_v49, %v4625_v40 }
 0x5fb   :  { %4293 = vmatmul.mubr.msk.f32.vlgmr.msra.gmra.mrb[2].mxu0 %vm331_vm5, %v503_v50 }
 0x5fc   :  { %v4631_v51 = vpop.eup %4630  ;;  %4301 = vmatpush3.xpose.msk.msra.mxu0 %vm331_vm5, %v660_v44  ;;  %4302 = vmatprep.mubr.msk.f32.mxu0 %vm4744_vm0, %v4743_v2 }
 0x5fd   :  { %v504_v52 = vmul.f32 %v4631_v51, %v4627_v42  ;;  %4310 = vmatprep.subr.mxu0 %v4743_v2 }
 0x5ff   :  { %4298 = vmatmul.mubr.msk.f32.vlgmr.msra.gmra.mrb[10].mxu1 %vm331_vm5, %v504_v52  ;;  %4303 = vmatmul.mubr.msk.f32.vlgmr.msra.gmra.mrb[4].mxu0 %vm331_vm5, %v658_v46 }
 0x600   :  { %4306 = vmatpush3.xpose.msk.msra.mxu1 %vm331_vm5, %v738_v45  ;;  %4307 = vmatprep.mubr.msk.f32.mxu1 %vm4744_vm0, %v4743_v2 }
 0x601   :  { %4315 = vmatprep.subr.mxu1 %v4743_v2  ;;  %4312 = vmatprep.mubr.msk.f32.mxu0 %vm4744_vm0, %v4743_v2 }
 0x603   :  { %4308 = vmatmul.mubr.msk.f32.vlgmr.msra.gmra.mrb[12].mxu1 %vm331_vm5, %v736_v53 }
 0x604   :  { %4317 = vmatprep.mubr.msk.f32.mxu1 %vm4744_vm0, %v4743_v2 }
 0x6ce   :  { %v5009_v54 = vpop.f32.mrb[2].mxu0 }
 0x6cf   :  { %v4294_v55 = vpop.f32.mrb[3].mxu0 }
 0x6d2   :  { %v5011_v56 = vpop.f32.mrb[10].mxu1  ;;  %v731_v57 = vpop.f32.mrb[4].mxu0 }
 0x6d3   :  { %v732_v59 = vadd.f32 %v731_v57, %v4969_v21  ;;  %v4299_v60 = vpop.f32.mrb[11].mxu1  ;;  %v4304_v61 = vpop.f32.mrb[5].mxu0 }
 0x6d5   :  { %v813_v63 = vsel %vm331_vm5, %v732_v59, -inf }
 0x6d6   :  { %814 = vmax.xlane.f32.xlu1 %v813_v63  ;;  %v809_v0 = vpop.f32.mrb[12].mxu1 }
 0x6d7   :  { %v810_v3 = vadd.f32 %v809_v0, %v4972_v26  ;;  %v4309_v4 = vpop.f32.mrb[13].mxu1 }
 0x6d9   :  { %v816_v7 = vsel %vm331_vm5, %v810_v3, -inf }
 0x6da   :  { %817 = vmax.xlane.f32.xlu0 %v816_v7 }
 0x6e7   :  { %911 = vrot.lane.b32.xlu1 %v4945_v62, %s4752_s21 }
 0x6eb   :  { %989 = vrot.lane.b32.xlu1 %v4941_v58, %s4753_s1 }
 0x6f0   :  { %835 = vrot.lane.b32.xlu0 %v4941_v58, %s4752_s21 }
 0x6f4   :  { %1067 = vrot.lane.b32.xlu0 %v4945_v62, %s4753_s1 }
 0x763   :  { %v815_v8 = vpop.xlane.xlu1 %814 }
 0x764   :  { %v819_v9 = vsub.f32 %v732_v59, %v815_v8 }
 0x766   :  { %v821_v10 = vmul.f32 1.442695, %v819_v9 }
 0x767   :  { %v912_v11 = vpop.permute.xlu1 %911  ;;  %v818_v13 = vpop.xlane.xlu0 %817 }
 0x768   :  { %4632 = vpow2.f32 %v821_v10  ;;  %v820_v14 = vsub.f32 %v810_v3, %v818_v13  ;;  %4316 = vmatpush3.msra.mxu1 %v912_v11 }
 0x769   :  { %4325 = vmatprep.subr.mxu1 %v4743_v2 }
 0x76a   :  { %v823_v15 = vmul.f32 1.442695, %v820_v14 }
 0x76b   :  { %v836_v16 = vpop.permute.xlu0 %835  ;;  %v990_v25 = vpop.permute.xlu1 %989 }
 0x76c   :  { %4634 = vpow2.f32 %v823_v15  ;;  %4311 = vmatpush3.msra.mxu0 %v836_v16 }
 0x76d   :  { %4320 = vmatprep.subr.mxu0 %v4743_v2 }
 0x76f   :  { %v1068_v24 = vpop.permute.xlu0 %1067 }
 0x772   :  { %v4633_v17 = vpop.eup %4632 }
 0x773   :  { %v825_v18 = vsel %vm331_vm5, %v4633_v17, 0.0 }
 0x774   :  { %826 = vadd.xlane.f32.xlu0 %v825_v18 }
 0x776   :  { %v4635_v19 = vpop.eup %4634 }
 0x777   :  { %v828_v22 = vsel %vm331_vm5, %v4635_v19, 0.0 }
 0x778   :  { %829 = vadd.xlane.f32.xlu1 %v828_v22 }
 0x789   :  { %987 = vrot.lane.b32.xlu1 %v4941_v58, %s4754_s2 }
 0x78a   :  { %1065 = vrot.lane.b32.xlu0 %v4945_v62, %s4754_s2 }
 0x801   :  { %v827_v27 = vpop.xlane.xlu0 %826 }
 0x802   :  { %4636 = vrcp.f32 %v827_v27 }
 0x805   :  { %v830_v28 = vpop.xlane.xlu1 %829  ;;  %v1066_v34 = vpop.permute.xlu0 %1065 }
 0x806   :  { %4638 = vrcp.f32 %v830_v28 }
 0x809   :  { %v988_v33 = vpop.permute.xlu1 %987 }
 0x80c   :  { %v4637_v29 = vpop.eup %4636 }
 0x80d   :  { %v833_v30 = vmul.f32 %v4637_v29, %v4633_v17 }
 0x80f   :  { %4313 = vmatmul.mubr.msk.f32.vlgmr.msra.gmra.mrb[6].mxu0 %vm331_vm5, %v833_v30 }
 0x810   :  { %v4639_v31 = vpop.eup %4638  ;;  %4321 = vmatpush3.xpose.msk.msra.mxu0 %vm331_vm5, %v990_v25  ;;  %4322 = vmatprep.mubr.msk.f32.mxu0 %vm4744_vm0, %v4743_v2 }
 0x811   :  { %v834_v32 = vmul.f32 %v4639_v31, %v4635_v19  ;;  %4330 = vmatprep.subr.mxu0 %v4743_v2 }
 0x813   :  { %4318 = vmatmul.mubr.msk.f32.vlgmr.msra.gmra.mrb[14].mxu1 %vm331_vm5, %v834_v32  ;;  %4323 = vmatmul.mubr.msk.f32.vlgmr.msra.gmra.mrb[8].mxu0 %vm331_vm5, %v988_v33 }
 0x814   :  { %4326 = vmatpush3.xpose.msk.msra.mxu1 %vm331_vm5, %v1068_v24  ;;  %4327 = vmatprep.mubr.msk.f32.mxu1 %vm4744_vm0, %v4743_v2 }
 0x815   :  { %4335 = vmatprep.subr.mxu1 %v4743_v2  ;;  %4332 = vmatprep.mubr.msk.f32.mxu0 %vm4744_vm0, %v4743_v2 }
 0x817   :  { %4328 = vmatmul.mubr.msk.f32.vlgmr.msra.gmra.mrb[16].mxu1 %vm331_vm5, %v1066_v34 }
 0x818   :  { %4337 = vmatprep.mubr.msk.f32.mxu1 %vm4744_vm0, %v4743_v2 }
 0x8e2   :  { %v5049_v35 = vpop.f32.mrb[6].mxu0 }
 0x8e3   :  { %v4314_v36 = vpop.f32.mrb[7].mxu0 }
 0x8e6   :  { %v5051_v37 = vpop.f32.mrb[14].mxu1  ;;  %v1061_v38 = vpop.f32.mrb[8].mxu0 }
 0x8e7   :  { %v4558_v39 = vpack.i.bf16 %v5051_v37, %v5049_v35  ;;  %v1062_v40 = vadd.f32 %v1061_v38, %v4969_v21  ;;  %v4319_v41 = vpop.f32.mrb[15].mxu1  ;;  %v4324_v42 = vpop.f32.mrb[9].mxu0 }
 0x8e9   :  { %v1143_v43 = vsel %vm331_vm5, %v1062_v40, -inf }
 0x8ea   :  { %1144 = vmax.xlane.f32.xlu1 %v1143_v43  ;;  %v1139_v44 = vpop.f32.mrb[16].mxu1 }
 0x8eb   :  { %v1140_v45 = vadd.f32 %v1139_v44, %v4972_v26  ;;  %v4329_v46 = vpop.f32.mrb[17].mxu1 }
 0x8ed   :  { %v1146_v47 = vsel %vm331_vm5, %v1140_v45, -inf }
 0x8ee   :  { %1147 = vmax.xlane.f32.xlu0 %v1146_v47 }
 0x8fb   :  { %1241 = vrot.lane.b32.xlu1 %v4945_v62, %s5577_s23 }
 0x8ff   :  { %1319 = vrot.lane.b32.xlu1 %v4941_v58, %s5575_s24 }
 0x904   :  { %1165 = vrot.lane.b32.xlu0 %v4941_v58, %s5577_s23 }
 0x908   :  { %1397 = vrot.lane.b32.xlu0 %v4945_v62, %s5575_s24 }
 0x977   :  { %v1145_v48 = vpop.xlane.xlu1 %1144 }
 0x978   :  { %v1149_v49 = vsub.f32 %v1062_v40, %v1145_v48 }
 0x97a   :  { %v1151_v50 = vmul.f32 1.442695, %v1149_v49  ;;  %v4595_v49 = vld [vmem:[%s5554_s8 + $0x8] sm:$0xff]  }
 0x97b   :  { %v1242_v51 = vpop.permute.xlu1 %1241  ;;  %v1148_v52 = vpop.xlane.xlu0 %1147 }
 0x97c   :  { %4640 = vpow2.f32 %v1151_v50  ;;  %v1150_v53 = vsub.f32 %v1140_v45, %v1148_v52  ;;  %4336 = vmatpush3.msra.mxu1 %v1242_v51 }
 0x97d   :  { %4345 = vmatprep.subr.mxu1 %v4743_v2 }
 0x97e   :  { %v1153_v55 = vmul.f32 1.442695, %v1150_v53 }
 0x97f   :  { %v1166_v57 = vpop.permute.xlu0 %1165  ;;  %v1320_v3 = vpop.permute.xlu1 %1319 }
 0x980   :  { %4642 = vpow2.f32 %v1153_v55  ;;  %4331 = vmatpush3.msra.mxu0 %v1166_v57 }
 0x981   :  { %4340 = vmatprep.subr.mxu0 %v4743_v2 }
 0x983   :  { %v1398_v0 = vpop.permute.xlu0 %1397 }
 0x986   :  { %v4641_v59 = vpop.eup %4640 }
 0x987   :  { %v1155_v60 = vsel %vm331_vm5, %v4641_v59, 0.0 }
 0x988   :  { %1156 = vadd.xlane.f32.xlu0 %v1155_v60 }
 0x98a   :  { %v4643_v61 = vpop.eup %4642 }
 0x98b   :  { %v1158_v63 = vsel %vm331_vm5, %v4643_v61, 0.0 }
 0x98c   :  { %1159 = vadd.xlane.f32.xlu1 %v1158_v63 }
 0x99d   :  { %1317 = vrot.lane.b32.xlu1 %v4941_v58, %s5572_s25 }
 0x99e   :  { %1395 = vrot.lane.b32.xlu0 %v4945_v62, %s5572_s25  ;;  %s5574_s25 = smov 24  }
 0xa15   :  { %v1157_v4 = vpop.xlane.xlu0 %1156 }
 0xa16   :  { %4644 = vrcp.f32 %v1157_v4 }
 0xa19   :  { %v1160_v7 = vpop.xlane.xlu1 %1159  ;;  %v1396_v14 = vpop.permute.xlu0 %1395 }
 0xa1a   :  { %4646 = vrcp.f32 %v1160_v7 }
 0xa1d   :  { %v1318_v13 = vpop.permute.xlu1 %1317 }
 0xa20   :  { %v4645_v8 = vpop.eup %4644 }
 0xa21   :  { %v1163_v9 = vmul.f32 %v4645_v8, %v4641_v59 }
 0xa23   :  { %4333 = vmatmul.mubr.msk.f32.vlgmr.msra.gmra.mrb[10].mxu0 %vm331_vm5, %v1163_v9 }
 0xa24   :  { %v4647_v10 = vpop.eup %4646  ;;  %4341 = vmatpush3.xpose.msk.msra.mxu0 %vm331_vm5, %v1320_v3  ;;  %4342 = vmatprep.mubr.msk.f32.mxu0 %vm4744_vm0, %v4743_v2 }
 0xa25   :  { %v1164_v11 = vmul.f32 %v4647_v10, %v4643_v61  ;;  %4350 = vmatprep.subr.mxu0 %v4743_v2 }
 0xa27   :  { %4338 = vmatmul.mubr.msk.f32.vlgmr.msra.gmra.mrb[18].mxu1 %vm331_vm5, %v1164_v11  ;;  %4343 = vmatmul.mubr.msk.f32.vlgmr.msra.gmra.mrb[12].mxu0 %vm331_vm5, %v1318_v13 }
 0xa28   :  { %4346 = vmatpush3.xpose.msk.msra.mxu1 %vm331_vm5, %v1398_v0  ;;  %4347 = vmatprep.mubr.msk.f32.mxu1 %vm4744_vm0, %v4743_v2 }
 0xa29   :  { %4355 = vmatprep.subr.mxu1 %v4743_v2  ;;  %4352 = vmatprep.mubr.msk.f32.mxu0 %vm4744_vm0, %v4743_v2 }
 0xa2b   :  { %4348 = vmatmul.mubr.msk.f32.vlgmr.msra.gmra.mrb[20].mxu1 %vm331_vm5, %v1396_v14 }
 0xa2c   :  { %4357 = vmatprep.mubr.msk.f32.mxu1 %vm4744_vm0, %v4743_v2 }
 0xaf6   :  { %v1237_v15 = vpop.f32.mrb[10].mxu0 }
 0xaf7   :  { %v4334_v16 = vpop.f32.mrb[11].mxu0 }
 0xafa   :  { %v1313_v17 = vpop.f32.mrb[18].mxu1  ;;  %v1391_v18 = vpop.f32.mrb[12].mxu0 }
 0xafb   :  { %v4563_v19 = vpack.i.bf16 %v1313_v17, %v1237_v15  ;;  %v1392_v22 = vadd.f32 %v1391_v18, %v4969_v21  ;;  %v4339_v24 = vpop.f32.mrb[19].mxu1  ;;  %v4344_v25 = vpop.f32.mrb[13].mxu0 }
 0xafd   :  { %v1473_v27 = vsel %vm331_vm5, %v1392_v22, -inf }
 0xafe   :  { %1474 = vmax.xlane.f32.xlu1 %v1473_v27  ;;  %v1469_v28 = vpop.f32.mrb[20].mxu1 }
 0xaff   :  { %v1470_v29 = vadd.f32 %v1469_v28, %v4972_v26  ;;  %v4349_v30 = vpop.f32.mrb[21].mxu1 }
 0xb01   :  { %v1476_v31 = vsel %vm331_vm5, %v1470_v29, -inf }
 0xb02   :  { %1477 = vmax.xlane.f32.xlu0 %v1476_v31 }
 0xb8b   :  { %v1475_v32 = vpop.xlane.xlu1 %1474 }
 0xb8c   :  { %v1479_v33 = vsub.f32 %v1392_v22, %v1475_v32 }
 0xb8e   :  { %v1481_v34 = vmul.f32 1.442695, %v1479_v33 }
 0xb8f   :  { %v1478_v36 = vpop.xlane.xlu0 %1477 }
 0xb90   :  { %4648 = vpow2.f32 %v1481_v34  ;;  %v1480_v38 = vsub.f32 %v1470_v29, %v1478_v36 }
 0xb92   :  { %v1483_v40 = vmul.f32 1.442695, %v1480_v38 }
 0xb94   :  { %4650 = vpow2.f32 %v1483_v40  ;;  %v4596_v40 = vld [vmem:[%s5558_s12] sm:$0xff]  }
 0xb9a   :  { %v4649_v41 = vpop.eup %4648 }
 0xb9b   :  { %v1485_v42 = vsel %vm331_vm5, %v4649_v41, 0.0 }
 0xb9c   :  { %1486 = vadd.xlane.f32.xlu0 %v1485_v42 }
 0xb9e   :  { %v4651_v43 = vpop.eup %4650 }
 0xb9f   :  { %v1488_v44 = vsel %vm331_vm5, %v4651_v43, 0.0 }
 0xba0   :  { %1489 = vadd.xlane.f32.xlu1 %v1488_v44 }
 0xbb1   :  { %1571 = vrot.lane.b32.xlu1 %v4945_v62, %s5570_s3 }
 0xbb2   :  { %1495 = vrot.lane.b32.xlu0 %v4941_v58, %s5570_s3 }
 0xbb5   :  { %4559 = vrot.lane.b32.xlu1 %v4558_v39, %s5569_s27  ;;  %v4594_v39 = vld [vmem:[%s5554_s8] sm:$0xff]  }
 0xbb6   :  { %4564 = vrot.lane.b32.xlu0 %v4563_v19, %s5568_s28 }
 0xc29   :  { %v1487_v45 = vpop.xlane.xlu0 %1486 }
 0xc2a   :  { %4652 = vrcp.f32 %v1487_v45 }
 0xc2d   :  { %v1490_v46 = vpop.xlane.xlu1 %1489  ;;  %v1496_v47 = vpop.permute.xlu0 %1495 }
 0xc2e   :  { %4654 = vrcp.f32 %v1490_v46  ;;  %4351 = vmatpush3.msra.mxu0 %v1496_v47 }
 0xc2f   :  { %4360 = vmatprep.subr.bf16.mxu0 %v4743_v2 }
 0xc31   :  { %v1572_v62 = vpop.permute.xlu1 %1571  ;;  %v4565_v61 = vpop.permute.xlu0 %4564 }
 0xc32   :  { %4356 = vmatpush3.msra.mxu1 %v1572_v62  ;;  %v4567_v3 = vunpack.i.h.bf16 %v4565_v61  ;;  %v4566_v4 = vunpack.i.l.bf16 %v4565_v61  ;;  %v4602_v61 = vld [vmem:[%s5560_s14 + $0x20] sm:$0xff]  }
 0xc33   :  { %4368 = vmatprep.subr.bf16.mxu1 %v4743_v2 }
 0xc34   :  { %v4653_v58 = vpop.eup %4652 }
 0xc35   :  { %v1493_v48 = vmul.f32 %v4653_v58, %v4649_v41  ;;  %v4560_v57 = vpop.permute.xlu1 %4559  ;;  %v4597_v41 = vld [vmem:[%s5558_s12 + $0x8] sm:$0xff]  }
 0xc36   :  { %v4562_v59 = vunpack.i.h.bf16 %v4560_v57  ;;  %v4561_v60 = vunpack.i.l.bf16 %v4560_v57  ;;  %v4599_v57 = vld [vmem:[%s5560_s14 + $0x8] sm:$0xff]  }
 0xc37   :  { %4353 = vmatmul.mubr.msk.f32.vlgmr.msra.gmra.mrb[14].mxu0 %vm331_vm5, %v1493_v48  ;;  %v4041_v48 = vld [vmem:[%s5556_s10] ss:$0 sm:$0xff] }
 0xc38   :  { %v4655_v35 = vpop.eup %4654  ;;  %4364 = vmatprep.mubr.msk.bf16.mxu0 %vm4744_vm0, %v4743_v2  ;;  %4361 = vmatpush3.bf16.msra.mxu0 %v4594_v39  ;;  %v1672_v63 = vsel %vm331_vm5, %v5011_v56, %v4562_v59  ;;  %v1671_v0 = vsel %vm331_vm5, %v5009_v54, %v4561_v60  ;;  %v4040_v56 = vld [vmem:[%s5555_s9] ss:$0 sm:$0xff]  ;;  %v4600_v59 = vld [vmem:[%s5560_s14 + $0x10] sm:$0xff]   ;;  %v4601_v60 = vld [vmem:[%s5560_s14 + $0x18] sm:$0xff]  }
 0xc39   :  { %v1494_v37 = vmul.f32 %v4655_v35, %v4651_v43  ;;  %4362 = vmatprep.subr.bf16.mxu0 %v4743_v2  ;;  %v1674_v10 = vsel %vm1673_vm13, %v1671_v0, %v4566_v4  ;;  %v1675_v11 = vsel %vm1673_vm13, %v1672_v63, %v4567_v3  ;;  %v4603_v63 = vld [vmem:[%s5560_s14 + $0x28] sm:$0xff]   ;;  %v4604_v0 = vld [vmem:[%s5560_s14 + $0x30] sm:$0xff]   ;;  %v4605_v3 = vld [vmem:[%s5560_s14 + $0x38] sm:$0xff]  }
 0xc3a   :  { %v4043_v4 = vld [vmem:[%s5559_s13] ss:$0 sm:$0xff] }
 0xc3b   :  { %4358 = vmatmul.mubr.msk.f32.vlgmr.msra.gmra.mrb[22].mxu1 %vm331_vm5, %v1494_v37 }
 0xc3c   :  { %4372 = vmatprep.mubr.msk.bf16.mxu1 %vm4744_vm0, %v4743_v2  ;;  %4363 = vmatpush3.bf16.msra.mxu0 %v4595_v49  ;;  %v4042_v49 = vld [vmem:[%s5557_s11] ss:$0 sm:$0xff] }
 0xc3d   :  { %4376 = vmatprep.subr.bf16.mxu0 %v4743_v2  ;;  %4369 = vmatpush3.bf16.msra.mxu1 %v4596_v40 }
 0xc3e   :  { %4370 = vmatprep.subr.bf16.mxu1 %v4743_v2 }
 0xc41   :  { %4371 = vmatpush3.bf16.msra.mxu1 %v4597_v41 }
 0xc42   :  { %4396 = vmatprep.subr.bf16.mxu1 %v4743_v2 }
 0xd0a   :  { %v1567_v50 = vpop.f32.mrb[14].mxu0 }
 0xd0b   :  { %v4354_v51 = vpop.f32.mrb[15].mxu0 }
 0xd0e   :  { %v1643_v52 = vpop.f32.mrb[22].mxu1 }
 0xd0f   :  { %v4568_v53 = vpack.i.bf16 %v1643_v52, %v1567_v50  ;;  %v4359_v55 = vpop.f32.mrb[23].mxu1 }
 0xd10   :  { %v4598_v55 = vld [vmem:[%s5560_s14] sm:$0xff]  }
 0xd11   :  { %4569 = vrot.lane.b32.xlu1 %v4568_v53, %s5574_s25  ;;  %s5593_s25 = smov 24  }
 0xd83   :  { %v4570_v7 = vpop.permute.xlu1 %4569 }
 0xd84   :  { %v4572_v8 = vunpack.i.h.bf16 %v4570_v7  ;;  %v4571_v9 = vunpack.i.l.bf16 %v4570_v7 }
 0xd86   :  { %v1678_v13 = vsel %vm1676_vm14, %v1675_v11, %v4572_v8  ;;  %v1677_v14 = vsel %vm1676_vm14, %v1674_v10, %v4571_v9 }
 0xd87   :  { %v1679_v15 = vpack.c.bf16 %v1678_v13, %v1677_v14 }
 0xd89   :  { %4365 = vmatmul.mubr.msk.bf16.vlgmr.msra.gmra.mrb[16].mxu0 %vm216_vm4, %v1679_v15 }
 0xd8a   :  { %4392 = vmatprep.mubr.msk.bf16.mxu0 %vm4744_vm0, %v4743_v2  ;;  %4377 = vmatpush3.bf16.msra.mxu0 %v4598_v55 }
 0xd8b   :  { %4378 = vmatprep.subr.bf16.mxu0 %v4743_v2 }
 0xd8e   :  { %4379 = vmatpush3.bf16.msra.mxu0 %v4599_v57  ;;  %v4060_v57 = vld [vmem:[%s5550_s4 + $0x1] ss:$0 sm:$0xff]  ;;  %s5587_s4 = smov 48  }
 0xd8f   :  { %4380 = vmatprep.subr.bf16.mxu0 %v4743_v2 }
 0xd92   :  { %4381 = vmatpush3.bf16.msra.mxu0 %v4600_v59 }
 0xd93   :  { %4382 = vmatprep.subr.bf16.mxu0 %v4743_v2 }
 0xd96   :  { %4383 = vmatpush3.bf16.msra.mxu0 %v4601_v60 }
 0xd97   :  { %4384 = vmatprep.subr.bf16.mxu0 %v4743_v2 }
 0xd9a   :  { %4385 = vmatpush3.bf16.msra.mxu0 %v4602_v61 }
 0xd9b   :  { %4386 = vmatprep.subr.bf16.mxu0 %v4743_v2 }
 0xd9e   :  { %4387 = vmatpush3.bf16.msra.mxu0 %v4603_v63 }
 0xd9f   :  { %4388 = vmatprep.subr.bf16.mxu0 %v4743_v2 }
 0xda2   :  { %4389 = vmatpush3.bf16.msra.mxu0 %v4604_v0  ;;  %v4061_v0 = vld [vmem:[%s5551_s5 + $0x1] ss:$0 sm:$0xff]  ;;  %s5588_s5 = smov 72  }
 0xda3   :  { %4390 = vmatprep.subr.bf16.mxu0 %v4743_v2 }
 0xda6   :  { %4391 = vmatpush3.bf16.msra.mxu0 %v4605_v3 }
 0xda7   :  { %4434 = vmatprep.subr.mxu0 %v4743_v2 }
 0xe5c   :  { %v1733_v54 = vpop.f32.mrb[16].mxu0 }
 0xe5d   :  { %v1740_v16 = vadd.f32 %v1733_v54, %v4909_v20  ;;  %v4366_v17 = vpop.f32.mrb[17].mxu0 }
 0xe5e   :  { %v1736_v18 = vpop.f32.mrb[18].mxu0 }
 0xe5f   :  { %v5138_v19 = vadd.f32 %v4040_v56, %v1740_v16  ;;  %v1741_v22 = vadd.f32 %v1736_v18, %v4911_v23  ;;  %v4367_v24 = vpop.f32.mrb[19].mxu0 }
 0xe61   :  { %v5141_v25 = vadd.f32 %v4040_v56, %v1741_v22  ;;  %v1753_v27 = vsel %vm216_vm4, %v5138_v19, 0.0 }
 0xe62   :  { %1754 = vadd.xlane.f32.xlu0 %v1753_v27 }
 0xe63   :  { %v1756_v28 = vsel %vm216_vm4, %v5141_v25, 0.0 }
 0xe64   :  { %1757 = vadd.xlane.f32.xlu1 %v1756_v28 }
 0xeef   :  { %v1755_v29 = vpop.xlane.xlu0 %1754 }
 0xef0   :  { %v1759_v30 = vmul.f32 0.03125, %v1755_v29 }
 0xef1   :  { %v1758_v20 = vpop.xlane.xlu1 %1757 }
 0xef2   :  { %v1761_v31 = vsub.f32 %v5138_v19, %v1759_v30  ;;  %v1760_v32 = vmul.f32 0.03125, %v1758_v20 }
 0xef4   :  { %v1762_v33 = vsub.f32 %v5141_v25, %v1760_v32  ;;  %v1763_v23 = vmul.f32 %v1761_v31, %v1761_v31 }
 0xef6   :  { %v1765_v34 = vsel %vm216_vm4, %v1763_v23, 0.0  ;;  %v1764_v36 = vmul.f32 %v1762_v33, %v1762_v33 }
 0xef7   :  { %1766 = vadd.xlane.f32.xlu0 %v1765_v34 }
 0xef8   :  { %v1768_v38 = vsel %vm216_vm4, %v1764_v36, 0.0 }
 0xefb   :  { %1769 = vadd.xlane.f32.xlu0 %v1768_v38 }
 0xf84   :  { %v1767_v42 = vpop.xlane.xlu0 %1766 }
 0xf85   :  { %v1771_v43 = vmul.f32 0.03125, %v1767_v42 }
 0xf87   :  { %v1773_v44 = vadd.f32 1e-05, %v1771_v43 }
 0xf88   :  { %v1770_v45 = vpop.xlane.xlu0 %1769 }
 0xf89   :  { %4656 = vrsqrt.f32 %v1773_v44  ;;  %v1772_v46 = vmul.f32 0.03125, %v1770_v45 }
 0xf8b   :  { %v1774_v47 = vadd.f32 1e-05, %v1772_v46 }
 0xf8d   :  { %4658 = vrsqrt.f32 %v1774_v47 }
 0xf93   :  { %v4657_v62 = vpop.eup %4656 }
 0xf94   :  { %v1777_v58 = vmul.f32 %v4657_v62, %v1761_v31  ;;  %v4057_v31 = vld [vmem:[%s5561_s15] ss:$0 sm:$0xff] }
 0xf96   :  { %v1785_v37 = vmul.f32 %v4041_v48, %v1777_v58 }
 0xf97   :  { %v4659_v35 = vpop.eup %4658 }
 0xf98   :  { %v1778_v39 = vmul.f32 %v4659_v35, %v1762_v33  ;;  %v1793_v51 = vadd.f32 %v4042_v49, %v1785_v37  ;;  %v4606_v35 = vld [vmem:[%s5552_s6 + $0x10] sm:$0xff]   ;;  %v4607_v37 = vld [vmem:[%s5552_s6 + $0x18] sm:$0xff]  }
 0xf9a   :  { %v1786_v50 = vmul.f32 %v4041_v48, %v1778_v39 }
 0xf9c   :  { %v1794_v52 = vadd.f32 %v4042_v49, %v1786_v50 }
 0xf9e   :  { %v1795_v53 = vpack.c.bf16 %v1794_v52, %v1793_v51 }
 0xfa0   :  { %4373 = vmatmul.mubr.msk.bf16.vlgmr.msra.gmra.mrb[24].mxu1 %vm216_vm4, %v1795_v53 }
 0xfa1   :  { %4400 = vmatprep.mubr.msk.bf16.mxu1 %vm4744_vm0, %v4743_v2  ;;  %4397 = vmatpush3.bf16.msra.mxu1 %v4606_v35 }
 0xfa2   :  { %4398 = vmatprep.subr.bf16.mxu1 %v4743_v2 }
 0xfa5   :  { %4399 = vmatpush3.bf16.msra.mxu1 %v4607_v37 }
 0xfa6   :  { %4404 = vmatprep.subr.mxu1 %v4743_v2 }
0x1073   :  { %v1856_v7 = vpop.f32.mrb[24].mxu1 }
0x1074   :  { %v1857_v8 = vadd.f32 %v4043_v4, %v1856_v7  ;;  %v4374_v9 = vpop.f32.mrb[25].mxu1 }
0x1075   :  { %v1859_v10 = vpop.f32.mrb[26].mxu1  ;;  %v4067_v9 = vld [vmem:[%s5553_s7 + $0x1] ss:$0 sm:$0xff]  ;;  %s5589_s7 = smov 104  }
0x1076   :  { %v4047_v11 = vmul.f32 -1.702, %v1857_v8  ;;  %v1860_v13 = vadd.f32 %v4043_v4, %v1859_v10  ;;  %v4375_v14 = vpop.f32.mrb[27].mxu1 }
0x1078   :  { %v1867_v15 = vmul.f32 1.442695, %v4047_v11  ;;  %v4048_v54 = vmul.f32 -1.702, %v1860_v13 }
0x107a   :  { %4660 = vpow2.f32 %v1867_v15  ;;  %v1869_v56 = vmul.f32 1.442695, %v4048_v54 }
0x107c   :  { %4662 = vpow2.f32 %v1869_v56 }
0x1084   :  { %v4661_v16 = vpop.eup %4660 }
0x1085   :  { %v1871_v17 = vadd.f32 1.0, %v4661_v16 }
0x1086   :  { %v4663_v18 = vpop.eup %4662 }
0x1087   :  { %4664 = vrcp.f32 %v1871_v17  ;;  %v1872_v22 = vadd.f32 1.0, %v4663_v18 }
0x1089   :  { %4666 = vrcp.f32 %v1872_v22 }
0x1091   :  { %v4665_v24 = vpop.eup %4664 }
0x1092   :  { %v1877_v28 = vmul.f32 %v4665_v24, %v1857_v8 }
0x1093   :  { %v4667_v27 = vpop.eup %4666 }
0x1094   :  { %v1878_v29 = vmul.f32 %v4667_v27, %v1860_v13 }
0x1096   :  { %v1879_v30 = vpack.c.bf16 %v1878_v29, %v1877_v28 }
0x1098   :  { %4393 = vmatmul.mubr.bf16.vlgmr.msra.gmra.mrb[20].mxu0 %v1879_v30 }
0x1099   :  { %4436 = vmatprep.mubr.msk.f32.mxu0 %vm4744_vm0, %v4743_v2 }
0x116b   :  { %v1978_v20 = vpop.f32.mrb[20].mxu0 }
0x116c   :  { %v1985_v32 = vadd.f32 %v1978_v20, %v5138_v19  ;;  %v4394_v33 = vpop.f32.mrb[21].mxu0 }
0x116d   :  { %v1981_v23 = vpop.f32.mrb[22].mxu0 }
0x116e   :  { %v5209_v34 = vadd.f32 %v4057_v31, %v1985_v32  ;;  %v1986_v36 = vadd.f32 %v1981_v23, %v5141_v25  ;;  %v4395_v38 = vpop.f32.mrb[23].mxu0 }
0x1170   :  { %v5212_v40 = vadd.f32 %v4057_v31, %v1986_v36  ;;  %v2000_v41 = vsel %vm216_vm4, %v5209_v34, 0.0 }
0x1171   :  { %2001 = vadd.xlane.f32.xlu1 %v2000_v41 }
0x1172   :  { %v2003_v42 = vsel %vm216_vm4, %v5212_v40, 0.0 }
0x1173   :  { %2004 = vadd.xlane.f32.xlu0 %v2003_v42 }
0x11fe   :  { %v2002_v43 = vpop.xlane.xlu1 %2001 }
0x11ff   :  { %v2006_v44 = vmul.f32 0.03125, %v2002_v43 }
0x1200   :  { %v2005_v19 = vpop.xlane.xlu0 %2004 }
0x1201   :  { %v2008_v45 = vsub.f32 %v5209_v34, %v2006_v44  ;;  %v2007_v46 = vmul.f32 0.03125, %v2005_v19 }
0x1203   :  { %v2009_v47 = vsub.f32 %v5212_v40, %v2007_v46  ;;  %v2010_v25 = vmul.f32 %v2008_v45, %v2008_v45 }
0x1205   :  { %v2012_v62 = vsel %vm216_vm4, %v2010_v25, 0.0  ;;  %v2011_v58 = vmul.f32 %v2009_v47, %v2009_v47 }
0x1206   :  { %2013 = vadd.xlane.f32.xlu1 %v2012_v62 }
0x1207   :  { %v2015_v48 = vsel %vm216_vm4, %v2011_v58, 0.0 }
0x1208   :  { %2016 = vadd.xlane.f32.xlu0 %v2015_v48 }
0x1293   :  { %v2014_v39 = vpop.xlane.xlu1 %2013 }
0x1294   :  { %v2018_v49 = vmul.f32 0.03125, %v2014_v39 }
0x1295   :  { %v2017_v50 = vpop.xlane.xlu0 %2016 }
0x1296   :  { %v2020_v51 = vadd.f32 1e-05, %v2018_v49  ;;  %v2019_v52 = vmul.f32 0.03125, %v2017_v50 }
0x1298   :  { %4668 = vrsqrt.f32 %v2020_v51  ;;  %v2021_v53 = vadd.f32 1e-05, %v2019_v52 }
0x129a   :  { %4670 = vrsqrt.f32 %v2021_v53 }
0x12a2   :  { %v4669_v55 = vpop.eup %4668 }
0x12a3   :  { %v2024_v59 = vmul.f32 %v4669_v55, %v2008_v45 }
0x12a4   :  { %v4671_v60 = vpop.eup %4670 }
0x12a5   :  { %v2032_v61 = vmul.f32 %v4060_v57, %v2024_v59  ;;  %v2025_v63 = vmul.f32 %v4671_v60, %v2009_v47 }
0x12a7   :  { %v2033_v3 = vmul.f32 %v4060_v57, %v2025_v63  ;;  %v2040_v4 = vadd.f32 %v4061_v0, %v2032_v61 }
0x12a9   :  { %v2041_v7 = vadd.f32 %v4061_v0, %v2033_v3 }
0x12ab   :  { %v2042_v8 = vpack.c.bf16 %v2041_v7, %v2040_v4 }
0x12ad   :  { %4401 = vmatmul.mubr.msk.bf16.vlgmr.msra.gmra.mrb[28].mxu1 %vm216_vm4, %v2042_v8 }
0x12ae   :  { %4406 = vmatprep.mubr.msk.f32.mxu1 %vm4744_vm0, %v4743_v2 }
0x1380   :  { %v2105_v10 = vpop.f32.mrb[28].mxu1 }
0x1381   :  { %v5242_v11 = vadd.f32 %v4067_v9, %v2105_v10  ;;  %v4402_v13 = vpop.f32.mrb[29].mxu1 }
0x1382   :  { %v2108_v14 = vpop.f32.mrb[30].mxu1 }
0x1383   :  { %v5244_v15 = vadd.f32 %v4067_v9, %v2108_v14  ;;  %2113 = vrot.lane.b32.xlu1 %v5242_v11, %s4745_s26  ;;  %v4403_v54 = vpop.f32.mrb[31].mxu1 }
0x1385   :  { %2190 = vrot.lane.b32.xlu0 %v5244_v15, %s4745_s26  ;;  %s5590_s26 = smov 40  }
0x13f5   :  { %v2114_v56 = vpop.permute.xlu1 %2113 }
0x13f6   :  { %4405 = vmatpush3.xpose.msk.msra.mxu1 %vm331_vm5, %v2114_v56 }
0x13f7   :  { %4409 = vmatprep.subr.mxu1 %v4743_v2  ;;  %v2191_v16 = vpop.permute.xlu0 %2190 }
0x13f9   :  { %4407 = vmatmul.mubr.msk.f32.vlgmr.msra.gmra.mrb[32].mxu1 %vm331_vm5, %v5242_v11 }
0x13fa   :  { %4410 = vmatpush3.xpose.msk.msra.mxu1 %vm331_vm5, %v2191_v16  ;;  %4411 = vmatprep.mubr.msk.f32.mxu1 %vm4744_vm0, %v4743_v2 }
0x13fb   :  { %4414 = vmatprep.subr.mxu1 %v4743_v2 }
0x13fd   :  { %4412 = vmatmul.mubr.msk.f32.vlgmr.msra.gmra.mrb[34].mxu1 %vm331_vm5, %v5244_v15 }
0x13fe   :  { %4416 = vmatprep.mubr.msk.f32.mxu1 %vm4744_vm0, %v4743_v2 }
0x14cc   :  { %v2185_v17 = vpop.f32.mrb[32].mxu1 }
0x14cd   :  { %v2186_v18 = vadd.f32 %v2185_v17, %v4969_v21  ;;  %v4408_v22 = vpop.f32.mrb[33].mxu1 }
0x14cf   :  { %v2266_v24 = vsel %vm331_vm5, %v2186_v18, -inf }
0x14d0   :  { %2267 = vmax.xlane.f32.xlu1 %v2266_v24  ;;  %v2262_v27 = vpop.f32.mrb[34].mxu1 }
0x14d1   :  { %v2263_v28 = vadd.f32 %v2262_v27, %v4972_v26  ;;  %v4413_v29 = vpop.f32.mrb[35].mxu1 }
0x14d3   :  { %v2269_v30 = vsel %vm331_vm5, %v2263_v28, -inf }
0x14d4   :  { %2270 = vmax.xlane.f32.xlu0 %v2269_v30 }
0x14e1   :  { %2288 = vrot.lane.b32.xlu1 %v5242_v11, %s4749_s0 }
0x155d   :  { %v2268_v20 = vpop.xlane.xlu1 %2267 }
0x155e   :  { %v2272_v31 = vsub.f32 %v2186_v18, %v2268_v20 }
0x1560   :  { %v2274_v32 = vmul.f32 1.442695, %v2272_v31 }
0x1561   :  { %v2289_v33 = vpop.permute.xlu1 %2288  ;;  %v2271_v23 = vpop.xlane.xlu0 %2270 }
0x1562   :  { %4672 = vpow2.f32 %v2274_v32  ;;  %v2273_v36 = vsub.f32 %v2263_v28, %v2271_v23  ;;  %4415 = vmatpush3.msra.mxu1 %v2289_v33 }
0x1563   :  { %4419 = vmatprep.subr.mxu1 %v4743_v2 }
0x1564   :  { %v2276_v38 = vmul.f32 1.442695, %v2273_v36 }
0x1566   :  { %4674 = vpow2.f32 %v2276_v38 }
0x156c   :  { %v4673_v41 = vpop.eup %4672 }
0x156d   :  { %v2278_v42 = vsel %vm331_vm5, %v4673_v41, 0.0 }
0x156e   :  { %2279 = vadd.xlane.f32.xlu1 %v2278_v42 }
0x1570   :  { %v4675_v43 = vpop.eup %4674 }
0x1571   :  { %v2281_v44 = vsel %vm331_vm5, %v4675_v43, 0.0 }
0x1572   :  { %2282 = vadd.xlane.f32.xlu0 %v2281_v44 }
0x157f   :  { %2442 = vrot.lane.b32.xlu1 %v5242_v11, %s4750_s30 }
0x1583   :  { %2440 = vrot.lane.b32.xlu1 %v5242_v11, %s4751_s20 }
0x1587   :  { %2518 = vrot.lane.b32.xlu1 %v5244_v15, %s4751_s20 }
0x1588   :  { %2364 = vrot.lane.b32.xlu0 %v5244_v15, %s4749_s0  ;;  %s5591_s0 = smov 8  }
0x158c   :  { %2520 = vrot.lane.b32.xlu0 %v5244_v15, %s4750_s30  ;;  %s5592_s30 = smov 16  }
0x15fb   :  { %v2280_v19 = vpop.xlane.xlu1 %2279 }
0x15fc   :  { %4676 = vrcp.f32 %v2280_v19 }
0x15ff   :  { %v2283_v45 = vpop.xlane.xlu0 %2282  ;;  %v2443_v58 = vpop.permute.xlu1 %2442 }
0x1600   :  { %4678 = vrcp.f32 %v2283_v45 }
0x1603   :  { %v2365_v25 = vpop.permute.xlu0 %2364  ;;  %v2441_v35 = vpop.permute.xlu1 %2440 }
0x1606   :  { %v4677_v46 = vpop.eup %4676 }
0x1607   :  { %v2286_v47 = vmul.f32 %v4677_v46, %v4673_v41  ;;  %v2521_v37 = vpop.permute.xlu0 %2520  ;;  %v2519_v39 = vpop.permute.xlu1 %2518 }
0x1609   :  { %4417 = vmatmul.mubr.msk.f32.vlgmr.msra.gmra.mrb[36].mxu1 %vm331_vm5, %v2286_v47 }
0x160a   :  { %v4679_v62 = vpop.eup %4678  ;;  %4420 = vmatpush3.msra.mxu1 %v2365_v25  ;;  %4421 = vmatprep.mubr.msk.f32.mxu1 %vm4744_vm0, %v4743_v2 }
0x160b   :  { %v2287_v48 = vmul.f32 %v4679_v62, %v4675_v43  ;;  %4424 = vmatprep.subr.mxu1 %v4743_v2 }
0x160d   :  { %4422 = vmatmul.mubr.msk.f32.vlgmr.msra.gmra.mrb[38].mxu1 %vm331_vm5, %v2287_v48 }
0x160e   :  { %4426 = vmatprep.mubr.msk.f32.mxu1 %vm4744_vm0, %v4743_v2 }
0x1611   :  { %4425 = vmatpush3.xpose.msk.msra.mxu1 %vm331_vm5, %v2443_v58 }
0x1612   :  { %4429 = vmatprep.subr.mxu1 %v4743_v2 }
0x1614   :  { %4427 = vmatmul.mubr.msk.f32.vlgmr.msra.gmra.mrb[40].mxu1 %vm331_vm5, %v2441_v35 }
0x1615   :  { %4430 = vmatpush3.xpose.msk.msra.mxu1 %vm331_vm5, %v2521_v37  ;;  %4431 = vmatprep.mubr.msk.f32.mxu1 %vm4744_vm0, %v4743_v2 }
0x1616   :  { %4439 = vmatprep.subr.mxu1 %v4743_v2 }
0x1618   :  { %4432 = vmatmul.mubr.msk.f32.vlgmr.msra.gmra.mrb[42].mxu1 %vm331_vm5, %v2519_v39 }
0x1619   :  { %4441 = vmatprep.mubr.msk.f32.mxu1 %vm4744_vm0, %v4743_v2 }
0x16dc   :  { %v5298_v49 = vpop.f32.mrb[36].mxu1 }
0x16dd   :  { %v4418_v50 = vpop.f32.mrb[37].mxu1 }
0x16e0   :  { %v5300_v51 = vpop.f32.mrb[38].mxu1 }
0x16e1   :  { %v4423_v52 = vpop.f32.mrb[39].mxu1 }
0x16e7   :  { %v2514_v53 = vpop.f32.mrb[40].mxu1 }
0x16e8   :  { %v2515_v55 = vadd.f32 %v2514_v53, %v4969_v21  ;;  %v4428_v57 = vpop.f32.mrb[41].mxu1 }
0x16ea   :  { %v2596_v59 = vsel %vm331_vm5, %v2515_v55, -inf }
0x16eb   :  { %2597 = vmax.xlane.f32.xlu0 %v2596_v59  ;;  %v2592_v60 = vpop.f32.mrb[42].mxu1 }
0x16ec   :  { %v2593_v61 = vadd.f32 %v2592_v60, %v4972_v26  ;;  %v4433_v63 = vpop.f32.mrb[43].mxu1 }
0x16ee   :  { %v2599_v0 = vsel %vm331_vm5, %v2593_v61, -inf }
0x16ef   :  { %2600 = vmax.xlane.f32.xlu1 %v2599_v0 }
0x1700   :  { %2618 = vrot.lane.b32.xlu1 %v5242_v11, %s4752_s21 }
0x1701   :  { %2694 = vrot.lane.b32.xlu0 %v5244_v15, %s4752_s21 }
0x1704   :  { %2772 = vrot.lane.b32.xlu1 %v5242_v11, %s4753_s1 }
0x1708   :  { %2850 = vrot.lane.b32.xlu1 %v5244_v15, %s4753_s1 }
0x170c   :  { %2848 = vrot.lane.b32.xlu1 %v5244_v15, %s4754_s2 }
0x1778   :  { %v2598_v3 = vpop.xlane.xlu0 %2597 }
0x1779   :  { %v2602_v4 = vsub.f32 %v2515_v55, %v2598_v3 }
0x177b   :  { %v2604_v7 = vmul.f32 1.442695, %v2602_v4 }
0x177c   :  { %v2695_v8 = vpop.permute.xlu0 %2694  ;;  %v2601_v9 = vpop.xlane.xlu1 %2600 }
0x177d   :  { %4680 = vpow2.f32 %v2604_v7  ;;  %v2603_v10 = vsub.f32 %v2593_v61, %v2601_v9  ;;  %4440 = vmatpush3.msra.mxu1 %v2695_v8 }
0x177e   :  { %4449 = vmatprep.subr.mxu1 %v4743_v2 }
0x177f   :  { %v2606_v13 = vmul.f32 1.442695, %v2603_v10 }
0x1780   :  { %v2619_v14 = vpop.permute.xlu1 %2618 }
0x1781   :  { %4682 = vpow2.f32 %v2606_v13  ;;  %4435 = vmatpush3.msra.mxu0 %v2619_v14 }
0x1782   :  { %4444 = vmatprep.subr.mxu0 %v4743_v2 }
0x1784   :  { %v2773_v24 = vpop.permute.xlu1 %2772 }
0x1787   :  { %v4681_v54 = vpop.eup %4680 }
0x1788   :  { %v2608_v56 = vsel %vm331_vm5, %v4681_v54, 0.0  ;;  %v2851_v30 = vpop.permute.xlu1 %2850 }
0x1789   :  { %2609 = vadd.xlane.f32.xlu0 %v2608_v56 }
0x178b   :  { %v4683_v16 = vpop.eup %4682 }
0x178c   :  { %v2611_v17 = vsel %vm331_vm5, %v4683_v16, 0.0  ;;  %v2849_v32 = vpop.permute.xlu1 %2848 }
0x178d   :  { %2612 = vadd.xlane.f32.xlu0 %v2611_v17 }
0x17a3   :  { %2770 = vrot.lane.b32.xlu0 %v5242_v11, %s4754_s2 }
0x1816   :  { %v2610_v18 = vpop.xlane.xlu0 %2609 }
0x1817   :  { %4684 = vrcp.f32 %v2610_v18 }
0x181a   :  { %v2613_v22 = vpop.xlane.xlu0 %2612 }
0x181b   :  { %4686 = vrcp.f32 %v2613_v22 }
0x181e   :  { %v2771_v31 = vpop.permute.xlu0 %2770 }
0x1821   :  { %v4685_v27 = vpop.eup %4684 }
0x1822   :  { %v2616_v28 = vmul.f32 %v4685_v27, %v4681_v54 }
0x1824   :  { %4437 = vmatmul.mubr.msk.f32.vlgmr.msra.gmra.mrb[24].mxu0 %vm331_vm5, %v2616_v28 }
0x1825   :  { %v4687_v29 = vpop.eup %4686  ;;  %4445 = vmatpush3.xpose.msk.msra.mxu0 %vm331_vm5, %v2773_v24  ;;  %4446 = vmatprep.mubr.msk.f32.mxu0 %vm4744_vm0, %v4743_v2 }
0x1826   :  { %v2617_v20 = vmul.f32 %v4687_v29, %v4683_v16  ;;  %4454 = vmatprep.subr.mxu0 %v4743_v2 }
0x1828   :  { %4442 = vmatmul.mubr.msk.f32.vlgmr.msra.gmra.mrb[44].mxu1 %vm331_vm5, %v2617_v20  ;;  %4447 = vmatmul.mubr.msk.f32.vlgmr.msra.gmra.mrb[26].mxu0 %vm331_vm5, %v2771_v31 }
0x1829   :  { %4450 = vmatpush3.xpose.msk.msra.mxu1 %vm331_vm5, %v2851_v30  ;;  %4451 = vmatprep.mubr.msk.f32.mxu1 %vm4744_vm0, %v4743_v2 }
0x182a   :  { %4459 = vmatprep.subr.mxu1 %v4743_v2  ;;  %4456 = vmatprep.mubr.msk.f32.mxu0 %vm4744_vm0, %v4743_v2 }
0x182c   :  { %4452 = vmatmul.mubr.msk.f32.vlgmr.msra.gmra.mrb[46].mxu1 %vm331_vm5, %v2849_v32 }
0x182d   :  { %4461 = vmatprep.mubr.msk.f32.mxu1 %vm4744_vm0, %v4743_v2 }
0x18f7   :  { %v5338_v33 = vpop.f32.mrb[24].mxu0 }
0x18f8   :  { %v4438_v23 = vpop.f32.mrb[25].mxu0 }
0x18fb   :  { %v5340_v36 = vpop.f32.mrb[44].mxu1  ;;  %v2844_v38 = vpop.f32.mrb[26].mxu0 }
0x18fc   :  { %v4573_v41 = vpack.i.bf16 %v5340_v36, %v5338_v33  ;;  %v2845_v42 = vadd.f32 %v2844_v38, %v4969_v21  ;;  %v4443_v43 = vpop.f32.mrb[45].mxu1  ;;  %v4448_v44 = vpop.f32.mrb[27].mxu0 }
0x18fe   :  { %v2926_v19 = vsel %vm331_vm5, %v2845_v42, -inf }
0x18ff   :  { %2927 = vmax.xlane.f32.xlu0 %v2926_v19  ;;  %v2922_v45 = vpop.f32.mrb[46].mxu1 }
0x1900   :  { %v2923_v46 = vadd.f32 %v2922_v45, %v4972_v26  ;;  %v4453_v47 = vpop.f32.mrb[47].mxu1 }
0x1902   :  { %v2929_v25 = vsel %vm331_vm5, %v2923_v46, -inf }
0x1903   :  { %2930 = vmax.xlane.f32.xlu1 %v2929_v25  ;;  %v4609_v25 = vld [vmem:[%s5554_s8 + $0x18] sm:$0xff]  }
0x1914   :  { %2948 = vrot.lane.b32.xlu1 %v5242_v11, %s5587_s4 }
0x1915   :  { %3024 = vrot.lane.b32.xlu0 %v5244_v15, %s5587_s4 }
0x1918   :  { %3102 = vrot.lane.b32.xlu1 %v5242_v11, %s5588_s5 }
0x191c   :  { %3180 = vrot.lane.b32.xlu1 %v5244_v15, %s5588_s5 }
0x1920   :  { %3178 = vrot.lane.b32.xlu1 %v5244_v15, %s5589_s7 }
0x198c   :  { %v2928_v62 = vpop.xlane.xlu0 %2927 }
0x198d   :  { %v2932_v58 = vsub.f32 %v2845_v42, %v2928_v62 }
0x198f   :  { %v2934_v48 = vmul.f32 1.442695, %v2932_v58 }
0x1990   :  { %v3025_v35 = vpop.permute.xlu0 %3024  ;;  %v2931_v37 = vpop.xlane.xlu1 %2930 }
0x1991   :  { %4688 = vpow2.f32 %v2934_v48  ;;  %v2933_v39 = vsub.f32 %v2923_v46, %v2931_v37  ;;  %4460 = vmatpush3.msra.mxu1 %v3025_v35 }
0x1992   :  { %4469 = vmatprep.subr.mxu1 %v4743_v2 }
0x1993   :  { %v2936_v50 = vmul.f32 1.442695, %v2933_v39 }
0x1994   :  { %v2949_v52 = vpop.permute.xlu1 %2948 }
0x1995   :  { %4690 = vpow2.f32 %v2936_v50  ;;  %4455 = vmatpush3.msra.mxu0 %v2949_v52 }
0x1996   :  { %4464 = vmatprep.subr.mxu0 %v4743_v2 }
0x1998   :  { %v3103_v63 = vpop.permute.xlu1 %3102 }
0x199b   :  { %v4689_v53 = vpop.eup %4688 }
0x199c   :  { %v2938_v55 = vsel %vm331_vm5, %v4689_v53, 0.0  ;;  %v3181_v7 = vpop.permute.xlu1 %3180 }
0x199d   :  { %2939 = vadd.xlane.f32.xlu0 %v2938_v55 }
0x199f   :  { %v4691_v57 = vpop.eup %4690 }
0x19a0   :  { %v2941_v59 = vsel %vm331_vm5, %v4691_v57, 0.0  ;;  %v3179_v10 = vpop.permute.xlu1 %3178 }
0x19a1   :  { %2942 = vadd.xlane.f32.xlu0 %v2941_v59 }
0x19b7   :  { %3100 = vrot.lane.b32.xlu0 %v5242_v11, %s5589_s7 }
0x1a2a   :  { %v2940_v60 = vpop.xlane.xlu0 %2939 }
0x1a2b   :  { %4692 = vrcp.f32 %v2940_v60 }
0x1a2e   :  { %v2943_v61 = vpop.xlane.xlu0 %2942 }
0x1a2f   :  { %4694 = vrcp.f32 %v2943_v61 }
0x1a32   :  { %v3101_v9 = vpop.permute.xlu0 %3100 }
0x1a35   :  { %v4693_v0 = vpop.eup %4692 }
0x1a36   :  { %v2946_v3 = vmul.f32 %v4693_v0, %v4689_v53 }
0x1a38   :  { %4457 = vmatmul.mubr.msk.f32.vlgmr.msra.gmra.mrb[28].mxu0 %vm331_vm5, %v2946_v3 }
0x1a39   :  { %v4695_v4 = vpop.eup %4694  ;;  %4465 = vmatpush3.xpose.msk.msra.mxu0 %vm331_vm5, %v3103_v63  ;;  %4466 = vmatprep.mubr.msk.f32.mxu0 %vm4744_vm0, %v4743_v2 }
0x1a3a   :  { %v2947_v8 = vmul.f32 %v4695_v4, %v4691_v57  ;;  %4474 = vmatprep.subr.mxu0 %v4743_v2 }
0x1a3c   :  { %4462 = vmatmul.mubr.msk.f32.vlgmr.msra.gmra.mrb[48].mxu1 %vm331_vm5, %v2947_v8  ;;  %4467 = vmatmul.mubr.msk.f32.vlgmr.msra.gmra.mrb[30].mxu0 %vm331_vm5, %v3101_v9 }
0x1a3d   :  { %4470 = vmatpush3.xpose.msk.msra.mxu1 %vm331_vm5, %v3181_v7  ;;  %4471 = vmatprep.mubr.msk.f32.mxu1 %vm4744_vm0, %v4743_v2 }
0x1a3e   :  { %4479 = vmatprep.subr.mxu1 %v4743_v2  ;;  %4476 = vmatprep.mubr.msk.f32.mxu0 %vm4744_vm0, %v4743_v2 }
0x1a40   :  { %4472 = vmatmul.mubr.msk.f32.vlgmr.msra.gmra.mrb[50].mxu1 %vm331_vm5, %v3179_v10 }
0x1a41   :  { %4481 = vmatprep.mubr.msk.f32.mxu1 %vm4744_vm0, %v4743_v2 }
0x1b0b   :  { %v3020_v13 = vpop.f32.mrb[28].mxu0 }
0x1b0c   :  { %v4458_v14 = vpop.f32.mrb[29].mxu0 }
0x1b0f   :  { %v3096_v54 = vpop.f32.mrb[48].mxu1  ;;  %v3174_v56 = vpop.f32.mrb[30].mxu0 }
0x1b10   :  { %v4578_v16 = vpack.i.bf16 %v3096_v54, %v3020_v13  ;;  %v3175_v17 = vadd.f32 %v3174_v56, %v4969_v21  ;;  %v4463_v18 = vpop.f32.mrb[49].mxu1  ;;  %v4468_v22 = vpop.f32.mrb[31].mxu0 }
0x1b12   :  { %v3256_v24 = vsel %vm331_vm5, %v3175_v17, -inf }
0x1b13   :  { %3257 = vmax.xlane.f32.xlu0 %v3256_v24  ;;  %v3252_v27 = vpop.f32.mrb[50].mxu1 }
0x1b14   :  { %v3253_v28 = vadd.f32 %v3252_v27, %v4972_v26  ;;  %v4473_v29 = vpop.f32.mrb[51].mxu1  ;;  %v5439_v27 = vld [vmem:[%s5584_s22] sm:$0x3] }
0x1b16   :  { %v3259_v30 = vsel %vm331_vm5, %v3253_v28, -inf }
0x1b17   :  { %3260 = vmax.xlane.f32.xlu1 %v3259_v30 }
0x1b28   :  { %3278 = vrot.lane.b32.xlu1 %v5242_v11, %s5590_s26 }
0x1b2c   :  { %4574 = vrot.lane.b32.xlu1 %v4573_v41, %s5591_s0 }
0x1b30   :  { %4579 = vrot.lane.b32.xlu1 %v4578_v16, %s5592_s30 }
0x1ba0   :  { %v3258_v21 = vpop.xlane.xlu0 %3257 }
0x1ba1   :  { %v3262_v20 = vsub.f32 %v3175_v17, %v3258_v21 }
0x1ba3   :  { %v3264_v31 = vmul.f32 1.442695, %v3262_v20 }
0x1ba4   :  { %v3261_v32 = vpop.xlane.xlu1 %3260 }
0x1ba5   :  { %4696 = vpow2.f32 %v3264_v31  ;;  %v3263_v26 = vsub.f32 %v3253_v28, %v3261_v32 }
0x1ba7   :  { %v3266_v23 = vmul.f32 1.442695, %v3263_v26 }
0x1ba8   :  { %v3279_v38 = vpop.permute.xlu1 %3278 }
0x1ba9   :  { %4698 = vpow2.f32 %v3266_v23  ;;  %4475 = vmatpush3.msra.mxu0 %v3279_v38 }
0x1baa   :  { %4484 = vmatprep.subr.bf16.mxu0 %v4743_v2 }
0x1bac   :  { %v4575_v39 = vpop.permute.xlu1 %4574 }
0x1bad   :  { %v4577_v52 = vunpack.i.h.bf16 %v4575_v39  ;;  %v4576_v53 = vunpack.i.l.bf16 %v4575_v39  ;;  %v4107_v39 = vld [vmem:[%s5557_s11 + $0x1] ss:$0 sm:$0xff]  ;;  %s4763_s11 = smov [#allocation2]  }
0x1bae   :  { %s3992_s0 = sshll.u32 %s4763_s11, 4  ;;  %s3993_s0 = int_to_ptr.vmem [resolvable:$true] %s3992_s0 }
0x1baf   :  { %v4697_v11 = vpop.eup %4696  ;;  %v3455_v60 = vsel %vm331_vm5, %v5300_v51, %v4577_v52  ;;  %v3454_v61 = vsel %vm331_vm5, %v5298_v49, %v4576_v53  ;;  %v4103_v49 = vld [vmem:[%s5555_s9 + $0x1] ss:$0 sm:$0xff]  ;;  %p4724_p1 = scmp.lt.s32.totalorder %s3993_s0, %s3993_s0 }
0x1bb0   :  { %v3268_v42 = vsel %vm331_vm5, %v4697_v11, 0.0  ;;  %v4580_v50 = vpop.permute.xlu1 %4579 }
0x1bb1   :  { %3269 = vadd.xlane.f32.xlu0 %v3268_v42  ;;  %v4582_v55 = vunpack.i.h.bf16 %v4580_v50  ;;  %v4581_v57 = vunpack.i.l.bf16 %v4580_v50  ;;  %v4611_v42 = vld [vmem:[%s5558_s12 + $0x18] sm:$0xff]  }
0x1bb3   :  { %v4699_v33 = vpop.eup %4698  ;;  %v3456_v3 = vsel %vm1673_vm13, %v3454_v61, %v4581_v57  ;;  %v3457_v4 = vsel %vm1673_vm13, %v3455_v60, %v4582_v55  ;;  %v4612_v57 = vld [vmem:[%s5560_s14 + $0x40] sm:$0xff]   ;;  %v4614_v60 = vld [vmem:[%s5560_s14 + $0x50] sm:$0xff]   ;;  %v4615_v61 = vld [vmem:[%s5560_s14 + $0x58] sm:$0xff]  }
0x1bb4   :  { %v3271_v36 = vsel %vm331_vm5, %v4699_v33, 0.0 }
0x1bb5   :  { %3272 = vadd.xlane.f32.xlu0 %v3271_v36 }
0x1bcb   :  { %3354 = vrot.lane.b32.xlu0 %v5244_v15, %s5590_s26  ;;  %v4608_v15 = vld [vmem:[%s5554_s8 + $0x10] sm:$0xff]  }
0x1c3e   :  { %v3270_v41 = vpop.xlane.xlu0 %3269 }
0x1c3f   :  { %4700 = vrcp.f32 %v3270_v41 }
0x1c42   :  { %v3273_v43 = vpop.xlane.xlu0 %3272 }
0x1c43   :  { %4702 = vrcp.f32 %v3273_v43 }
0x1c46   :  { %v3355_v44 = vpop.permute.xlu0 %3354 }
0x1c47   :  { %4480 = vmatpush3.msra.mxu1 %v3355_v44 }
0x1c48   :  { %4492 = vmatprep.subr.bf16.mxu1 %v4743_v2 }
0x1c49   :  { %v4701_v19 = vpop.eup %4700 }
0x1c4a   :  { %v3276_v45 = vmul.f32 %v4701_v19, %v4697_v11  ;;  %v4610_v11 = vld [vmem:[%s5558_s12 + $0x10] sm:$0xff]  }
0x1c4c   :  { %4477 = vmatmul.mubr.msk.f32.vlgmr.msra.gmra.mrb[32].mxu0 %vm331_vm5, %v3276_v45 }
0x1c4d   :  { %v4703_v46 = vpop.eup %4702  ;;  %4488 = vmatprep.mubr.msk.bf16.mxu0 %vm4744_vm0, %v4743_v2  ;;  %4485 = vmatpush3.bf16.msra.mxu0 %v4608_v15 }
0x1c4e   :  { %v3277_v47 = vmul.f32 %v4703_v46, %v4699_v33  ;;  %4486 = vmatprep.subr.bf16.mxu0 %v4743_v2 }
0x1c50   :  { %4482 = vmatmul.mubr.msk.f32.vlgmr.msra.gmra.mrb[52].mxu1 %vm331_vm5, %v3277_v47  ;;  %vm3855_vm5 = vcmask 1041409  }
0x1c51   :  { %4496 = vmatprep.mubr.msk.bf16.mxu1 %vm4744_vm0, %v4743_v2  ;;  %4487 = vmatpush3.bf16.msra.mxu0 %v4609_v25 }
0x1c52   :  { %4500 = vmatprep.subr.bf16.mxu0 %v4743_v2  ;;  %4493 = vmatpush3.bf16.msra.mxu1 %v4610_v11 }
0x1c53   :  { %4494 = vmatprep.subr.bf16.mxu1 %v4743_v2 }
0x1c56   :  { %4495 = vmatpush3.bf16.msra.mxu1 %v4611_v42 }
0x1d1f   :  { %v3350_v62 = vpop.f32.mrb[32].mxu0 }
0x1d20   :  { %v4478_v58 = vpop.f32.mrb[33].mxu0 }
0x1d23   :  { %v3426_v48 = vpop.f32.mrb[52].mxu1 }
0x1d24   :  { %v4583_v35 = vpack.i.bf16 %v3426_v48, %v3350_v62  ;;  %v4483_v37 = vpop.f32.mrb[53].mxu1  ;;  %v4106_v62 = vld [vmem:[%s5556_s10 + $0x1] ss:$0 sm:$0xff] }
0x1d26   :  { %4584 = vrot.lane.b32.xlu0 %v4583_v35, %s5593_s25 }
0x1d98   :  { %v4585_v59 = vpop.permute.xlu0 %4584 }
0x1d99   :  { %v4587_v63 = vunpack.i.h.bf16 %v4585_v59  ;;  %v4586_v0 = vunpack.i.l.bf16 %v4585_v59  ;;  %v4613_v59 = vld [vmem:[%s5560_s14 + $0x48] sm:$0xff]  }
0x1d9b   :  { %v3459_v7 = vsel %vm1676_vm14, %v3457_v4, %v4587_v63  ;;  %v3458_v8 = vsel %vm1676_vm14, %v3456_v3, %v4586_v0  ;;  %v4616_v63 = vld [vmem:[%s5560_s14 + $0x60] sm:$0xff]   ;;  %v4617_v0 = vld [vmem:[%s5560_s14 + $0x68] sm:$0xff]   ;;  %v4618_v3 = vld [vmem:[%s5560_s14 + $0x70] sm:$0xff]  }
0x1d9c   :  { %v3460_v9 = vpack.c.bf16 %v3459_v7, %v3458_v8  ;;  %v4619_v4 = vld [vmem:[%s5560_s14 + $0x78] sm:$0xff]  }
0x1d9e   :  { %4489 = vmatmul.mubr.msk.bf16.vlgmr.msra.gmra.mrb[36].mxu0 %vm216_vm4, %v3460_v9 }
0x1d9f   :  { %4516 = vmatprep.mubr.msk.bf16.mxu0 %vm4744_vm0, %v4743_v2  ;;  %4501 = vmatpush3.bf16.msra.mxu0 %v4612_v57 }
0x1da0   :  { %4502 = vmatprep.subr.bf16.mxu0 %v4743_v2 }
0x1da3   :  { %4503 = vmatpush3.bf16.msra.mxu0 %v4613_v59 }
0x1da4   :  { %4504 = vmatprep.subr.bf16.mxu0 %v4743_v2 }
0x1da7   :  { %4505 = vmatpush3.bf16.msra.mxu0 %v4614_v60 }
0x1da8   :  { %4506 = vmatprep.subr.bf16.mxu0 %v4743_v2 }
0x1dab   :  { %4507 = vmatpush3.bf16.msra.mxu0 %v4615_v61 }
0x1dac   :  { %4508 = vmatprep.subr.bf16.mxu0 %v4743_v2 }
0x1daf   :  { %4509 = vmatpush3.bf16.msra.mxu0 %v4616_v63 }
0x1db0   :  { %4510 = vmatprep.subr.bf16.mxu0 %v4743_v2 }
0x1db3   :  { %4511 = vmatpush3.bf16.msra.mxu0 %v4617_v0 }
0x1db4   :  { %4512 = vmatprep.subr.bf16.mxu0 %v4743_v2 }
0x1db7   :  { %4513 = vmatpush3.bf16.msra.mxu0 %v4618_v3 }
0x1db8   :  { %4514 = vmatprep.subr.bf16.mxu0 %v4743_v2 }
0x1dbb   :  { %4515 = vmatpush3.bf16.msra.mxu0 %v4619_v4 }
0x1e71   :  { %v3515_v51 = vpop.f32.mrb[36].mxu0 }
0x1e72   :  { %v3522_v10 = vadd.f32 %v3515_v51, %v5209_v34  ;;  %v4490_v13 = vpop.f32.mrb[37].mxu0 }
0x1e73   :  { %v3518_v14 = vpop.f32.mrb[38].mxu0 }
0x1e74   :  { %v5427_v54 = vadd.f32 %v4103_v49, %v3522_v10  ;;  %v3523_v56 = vadd.f32 %v3518_v14, %v5212_v40  ;;  %v4491_v16 = vpop.f32.mrb[39].mxu0  ;;  %v3786_v40 = vsel %vm3785_vm15, %v5439_v27, 2147483648 }
0x1e75   :  { %v3788_v21 = vshra.s32 %v3786_v40, 16  ;;  %v3787_v33 = vand.u32 65535, %v3786_v40  ;;  %v4113_v16 = vld [vmem:[%s5559_s13 + $0x1] ss:$0 sm:$0xff] }
0x1e76   :  { %v5430_v17 = vadd.f32 %v4103_v49, %v3523_v56  ;;  %v3538_v18 = vsel %vm216_vm4, %v5427_v54, 0.0 }
0x1e77   :  { %3539 = vadd.xlane.f32.xlu1 %v3538_v18  ;;  %v3790_v23 = vcvt.s32.f32 %v3788_v21  ;;  %v3789_v44 = vcvt.s32.f32 %v3787_v33 }
0x1e78   :  { %v3541_v22 = vsel %vm216_vm4, %v5430_v17, 0.0 }
0x1e79   :  { %3542 = vadd.xlane.f32.xlu0 %v3541_v22 }
0x1f04   :  { %v3540_v24 = vpop.xlane.xlu1 %3539 }
0x1f05   :  { %v3544_v34 = vmul.f32 0.03125, %v3540_v24 }
0x1f06   :  { %v3543_v28 = vpop.xlane.xlu0 %3542 }
0x1f07   :  { %v3546_v29 = vsub.f32 %v5427_v54, %v3544_v34  ;;  %v3545_v30 = vmul.f32 0.03125, %v3543_v28 }
0x1f09   :  { %v3547_v20 = vsub.f32 %v5430_v17, %v3545_v30  ;;  %v3548_v31 = vmul.f32 %v3546_v29, %v3546_v29 }
0x1f0b   :  { %v3550_v32 = vsel %vm216_vm4, %v3548_v31, 0.0  ;;  %v3549_v26 = vmul.f32 %v3547_v20, %v3547_v20 }
0x1f0c   :  { %3551 = vadd.xlane.f32.xlu0 %v3550_v32 }
0x1f0d   :  { %v3553_v38 = vsel %vm216_vm4, %v3549_v26, 0.0 }
0x1f0e   :  { %3554 = vadd.xlane.f32.xlu1 %v3553_v38 }
0x1f10   :  { %3791 = vmax.xlane.f32.xlu0 %v3790_v23 }
0x1f99   :  { %v3552_v36 = vpop.xlane.xlu0 %3551 }
0x1f9a   :  { %v3556_v41 = vmul.f32 0.03125, %v3552_v36 }
0x1f9b   :  { %v3555_v43 = vpop.xlane.xlu1 %3554 }
0x1f9c   :  { %v3558_v19 = vadd.f32 1e-05, %v3556_v41  ;;  %v3557_v45 = vmul.f32 0.03125, %v3555_v43 }
0x1f9d   :  { %v3792_v46 = vpop.xlane.xlu0 %3791 }
0x1f9e   :  { %4704 = vrsqrt.f32 %v3558_v19  ;;  %v3559_v47 = vadd.f32 1e-05, %v3557_v45  ;;  %vm3793_vm1 = vcmp.eq.f32.partialorder %v3790_v23, %v3792_v46  ;;  %v3798_v7 = vcvt.f32.s32 %v3792_v46 }
0x1f9f   :  { %v3794_v15 = vsel %vm3793_vm1, %v3789_v44, -inf }
0x1fa0   :  { %4706 = vrsqrt.f32 %v3559_v47  ;;  %3795 = vmax.xlane.f32.xlu1 %v3794_v15  ;;  %v3799_v9 = vshll.u32 %v3798_v7, 16 }
0x1fa8   :  { %v4705_v25 = vpop.eup %4704 }
0x1fa9   :  { %v3562_v58 = vmul.f32 %v4705_v25, %v3546_v29 }
0x1faa   :  { %v4707_v48 = vpop.eup %4706 }
0x1fab   :  { %v3570_v35 = vmul.f32 %v4106_v62, %v3562_v58  ;;  %v3563_v37 = vmul.f32 %v4707_v48, %v3547_v20 }
0x1fad   :  { %v3571_v50 = vmul.f32 %v4106_v62, %v3563_v37  ;;  %v3578_v52 = vadd.f32 %v4107_v39, %v3570_v35 }
0x1faf   :  { %v3579_v53 = vadd.f32 %v4107_v39, %v3571_v50 }
0x1fb1   :  { %v3580_v55 = vpack.c.bf16 %v3579_v53, %v3578_v52 }
0x1fb3   :  { %4497 = vmatmul.mubr.msk.bf16.vlgmr.msra.gmra.mrb[56].mxu1 %vm216_vm4, %v3580_v55 }
0x1fb4   :  { %4528 = vmatprep.mubr.msk.f32.mxu1 %vm4744_vm0, %v4743_v2 }
0x202d   :  { %v3796_v8 = vpop.xlane.xlu1 %3795 }
0x202e   :  { %v3797_v51 = vcvt.f32.s32 %v3796_v8 }
0x2030   :  { %v3800_v49 = vadd.s32 %v3799_v9, %v3797_v51 }
0x2032   :  { %vm3801_vm0 = vcmp.eq.s32.totalorder %v5439_v27, %v3800_v49 }
0x2033   :  { %v3802_v10 = vsel %vm3801_vm0, %v4898_v12, 8 }
0x2034   :  { %v3803_v13 = vsel %vm3785_vm15, %v3802_v10, 2147483647 }
0x2035   :  { %v3805_v14 = vshra.s32 %v3803_v13, 16  ;;  %v3804_v36 = vand.u32 65535, %v3803_v13 }
0x2037   :  { %v3807_v56 = vcvt.s32.f32 %v3805_v14  ;;  %v3806_v43 = vcvt.s32.f32 %v3804_v36  ;;  %v4146_v36 = vld [vmem:[%s5562_s16] ss:$0 sm:$0xff]  ;;  %s4719_s16 = scalar_lea.vmem %s3993_s0, 32 }
0x2038   :  { %p4720_p0 = scmp.ne.s32.totalorder %s3993_s0, %s4719_s16  ;;  %p4725_p2 = scmp.lt.s32.totalorder %s4719_s16, %s4719_s16 }
0x2039   :  { %3808 = vmin.xlane.f32.xlu0 %v3807_v56 }
0x203a   :  { %p4726_p3 = por %p4725_p2, %p4724_p1 }
0x203c   :  { %p4727_p4 = pnand %p4726_p3, %p4720_p0 }
0x2086   :  { %v3643_v18 = vpop.f32.mrb[56].mxu1 }
0x2087   :  { %v3644_v22 = vadd.f32 %v4113_v16, %v3643_v18  ;;  %v4498_v24 = vpop.f32.mrb[57].mxu1 }
0x2088   :  { %v3646_v34 = vpop.f32.mrb[58].mxu1 }
0x2089   :  { %v4117_v40 = vmul.f32 -1.702, %v3644_v22  ;;  %v3647_v28 = vadd.f32 %v4113_v16, %v3646_v34  ;;  %v4499_v29 = vpop.f32.mrb[59].mxu1 }
0x208a   :  { %v3904_v29 = vld [vmem:[%s5564_s18] sm:$0xff] }
0x208b   :  { %v3654_v30 = vmul.f32 1.442695, %v4117_v40  ;;  %v4118_v27 = vmul.f32 -1.702, %v3647_v28 }
0x208d   :  { %4708 = vpow2.f32 %v3654_v30  ;;  %v3656_v21 = vmul.f32 1.442695, %v4118_v27  ;;  %v3905_v30 = vld [vmem:[%s5564_s18 + $0x8] sm:$0xff]  ;;  %v3906_v27 = vld [vmem:[%s5564_s18 + $0x10] sm:$0xff] }
0x208f   :  { %4710 = vpow2.f32 %v3656_v21  ;;  %v4762_v21 = vmov 0.0|0.0  }
0x2090   :  { %4531 = vmatprep.subr.bf16.mxu1 %v4762_v21 }
0x2097   :  { %v4709_v20 = vpop.eup %4708 }
0x2098   :  { %v3658_v31 = vadd.f32 1.0, %v4709_v20  ;;  %v4532_v20 = vpack.c.bf16 %v3905_v30, %v3904_v29 }
0x2099   :  { %v4711_v32 = vpop.eup %4710 }
0x209a   :  { %4712 = vrcp.f32 %v3658_v31  ;;  %v3659_v26 = vadd.f32 1.0, %v4711_v32  ;;  %v3907_v31 = vld [vmem:[%s5564_s18 + $0x18] sm:$0xff]  ;;  %4533 = vmatpush3.bf16.msra.mxu1 %v4532_v20 }
0x209b   :  { %v4535_v32 = vpack.c.bf16 %v3907_v31, %v3906_v27  ;;  %4534 = vmatprep.subr.bf16.mxu1 %v4762_v21 }
0x209c   :  { %4714 = vrcp.f32 %v3659_v26 }
0x209e   :  { %4536 = vmatpush3.bf16.msra.mxu1 %v4535_v32 }
0x20a4   :  { %v4713_v23 = vpop.eup %4712 }
0x20a5   :  { %v3664_v11 = vmul.f32 %v4713_v23, %v3644_v22 }
0x20a6   :  { %v4715_v38 = vpop.eup %4714 }
0x20a7   :  { %v3665_v42 = vmul.f32 %v4715_v38, %v3647_v28 }
0x20a9   :  { %v3666_v33 = vpack.c.bf16 %v3665_v42, %v3664_v11 }
0x20ab   :  { %4517 = vmatmul.mubr.bf16.vlgmr.msra.gmra.mrb[40].mxu0 %v3666_v33 }
0x20c6   :  { %v3809_v41 = vpop.xlane.xlu0 %3808 }
0x20c7   :  { %vm3810_vm2 = vcmp.eq.f32.partialorder %v3807_v56, %v3809_v41  ;;  %v3815_v19 = vcvt.f32.s32 %v3809_v41 }
0x20c8   :  { %v3811_v44 = vsel %vm3810_vm2, %v3806_v43, inf }
0x20c9   :  { %3812 = vmin.xlane.f32.xlu1 %v3811_v44  ;;  %v3816_v46 = vshll.u32 %v3815_v19, 16  ;;  %v4147_v19 = vld [vmem:[%s5563_s17] ss:$0 sm:$0xff] }
0x2156   :  { %v3813_v45 = vpop.xlane.xlu1 %3812 }
0x2157   :  { %v3814_v47 = vcvt.f32.s32 %v3813_v45 }
0x2159   :  { %v3817_v15 = vadd.s32 %v3816_v46, %v3814_v47 }
0x215b   :  { %vm3818_vm3 = vcmp.eq.s32.totalorder %v4898_v12, %v3817_v15  ;;  %v4144_v12 = vld [vmem:[%s5561_s15 + $0x1] ss:$0 sm:$0xff] }
0x215c   :  { %v4145_v25 = vsel %vm3818_vm3, 1.0, %v4743_v2 }
0x215d   :  { %v3831_v62 = vrot.slane %v4145_v25, %v77_v6  ;;  %v3824_v58 = vrot.slane %v4145_v25, %v4875_v5 }
0x215f   :  { %3833 = vbcast.lane.b32.xlu1 %v3831_v62, 256  ;;  %3826 = vbcast.lane.b32.xlu0 %v3824_v58, 256 }
0x217e   :  { %v3766_v48 = vpop.f32.mrb[40].mxu0 }
0x217f   :  { %v4518_v35 = vpop.f32.mrb[41].mxu0  ;;  %v3773_v50 = vadd.f32 %v3766_v48, %v5427_v54 }
0x2180   :  { %v3769_v37 = vpop.f32.mrb[42].mxu0 }
0x2181   :  { %v4519_v39 = vpop.f32.mrb[43].mxu0  ;;  %v3774_v52 = vadd.f32 %v3769_v37, %v5430_v17  ;;  %v3783_v53 = vadd.f32 %v4144_v12, %v3773_v50 }
0x2183   :  { %v3784_v2 = vadd.f32 %v4144_v12, %v3774_v52 }
0x21d1   :  { %v3834_v1 = vpop.permute.xlu1 %3833  ;;  %v3827_v6 = vpop.permute.xlu0 %3826 }
0x21d2   :  { %v3836_v55 = vmul.f32 %v3834_v1, %v3784_v2  ;;  %v3835_v5 = vmul.f32 %v3827_v6, %v3783_v53 }
0x21d4   :  { %v3844_v57 = vsel %vm216_vm4, %v3836_v55, 0.0  ;;  %v3837_v59 = vsel %vm216_vm4, %v3835_v5, 0.0 }
0x21d5   :  { %v3845_v60 = vrot.slane %v3844_v57, 4  ;;  %v3838_v61 = vrot.slane %v3837_v59, 4 }
0x21d7   :  { %v3846_v63 = vadd.f32 %v3845_v60, %v3844_v57  ;;  %v3839_v54 = vadd.f32 %v3838_v61, %v3837_v59 }
0x21d9   :  { %v3847_v0 = vrot.slane %v3846_v63, 2  ;;  %v3840_v17 = vrot.slane %v3839_v54, 2 }
0x21db   :  { %v3848_v3 = vadd.f32 %v3847_v0, %v3846_v63  ;;  %v3841_v4 = vadd.f32 %v3840_v17, %v3839_v54 }
0x21dd   :  { %v3849_v7 = vrot.slane %v3848_v3, 1  ;;  %v3842_v8 = vrot.slane %v3841_v4, 1 }
0x21df   :  { %v3843_v9 = vadd.f32 %v3842_v8, %v3841_v4  ;;  %v3850_v51 = vadd.f32 %v3849_v7, %v3848_v3 }
0x21e1   :  { %v3856_v49 = vsel %vm3855_vm5, %v3850_v51, %v3843_v9 }
0x21e2   :  { %v3859_v10 = vsel %vm3858_vm6, %v3856_v49, 0.0 }
0x21e3   :  { %3860 = vadd.xlane.f32.xlu1 %v3859_v10 }
0x2270   :  { %v3861_v13 = vpop.xlane.xlu1 %3860 }
0x2271   :  { %v3862_v14 = vmul.f32 0.03125, %v3861_v13 }
0x2273   :  { %v3864_v56 = vrot.slane %v3862_v14, 1  ;;  %v3867_v16 = vsub.f32 %v3843_v9, %v3862_v14 }
0x2275   :  { %v3868_v18 = vsub.f32 %v3850_v51, %v3864_v56  ;;  %v3869_v24 = vmul.f32 %v3867_v16, %v3867_v16 }
0x2277   :  { %v3870_v22 = vmul.f32 %v3868_v18, %v3868_v18 }
0x2279   :  { %v3873_v34 = vrot.slane %v3870_v22, 7 }
0x227b   :  { %v3874_v40 = vsel %vm3855_vm5, %v3873_v34, %v3869_v24 }
0x227c   :  { %v3876_v28 = vsel %vm3858_vm6, %v3874_v40, 0.0 }
0x227d   :  { %3877 = vadd.xlane.f32.xlu0 %v3876_v28 }
0x230a   :  { %v3878_v26 = vpop.xlane.xlu0 %3877 }
0x230b   :  { %v3879_v23 = vmul.f32 0.03125, %v3878_v26 }
0x230d   :  { %v3880_v38 = vadd.f32 1e-05, %v3879_v23 }
0x230f   :  { %4716 = vrsqrt.f32 %v3880_v38 }
0x2319   :  { %v4717_v11 = vpop.eup %4716 }
0x231a   :  { %v3883_v42 = vrot.slane %v4717_v11, 1  ;;  %v3886_v33 = vmul.f32 %v4717_v11, %v3867_v16 }
0x231c   :  { %v3887_v41 = vmul.f32 %v3883_v42, %v3868_v18  ;;  %v3894_v43 = vmul.f32 %v4146_v36, %v3886_v33 }
0x231e   :  { %v3895_v44 = vmul.f32 %v4146_v36, %v3887_v41  ;;  %v3902_v46 = vadd.f32 %v4147_v19, %v3894_v43 }
0x2320   :  { %v3903_v45 = vadd.f32 %v4147_v19, %v3895_v44 }
0x2322   :  { %v3910_v47 = vrot.slane %v3903_v45, 7 }
0x2324   :  { %v3911_v15 = vsel %vm3855_vm5, %v3910_v47, %v3902_v46 }
0x2325   :  { %4529 = vmatmul.mubr.msk.f32.vlgmr.msra.gmra.mrb[54].mxu1 %vm216_vm4, %v3911_v15 }
0x23f8   :  { %v3980_v25 = vpop.f32.mrb[54].mxu1 }
0x23f9   :  { %3985 = vst.msk [vmem:[#allocation2] sm:$0x3] %vm3984_vm7, %v3980_v25  ;;  %v4530_v62 = vpop.f32.mrb[55].mxu1 }
0x23fa   :  { %4730 = shalt.err (!%p4727_p4)
}
0x23fb   :  { %s4731_s20 = scalar_lea.hbm %s5565_s19, 32 }
0x23fc   :  { %p4732_p5 = scmp.ne.s32.totalorder %s5565_s19, %s4731_s20  ;;  %p4735_p6 = scmp.lt.u32.totalorder %s4731_s20, %s5565_s19 }
0x23fe   :  { %p4737_p7 = pnand %p4735_p6, %p4732_p5 }
0x2400   :  { %4740 = shalt.err (!%p4737_p7)
}
0x2401   :  { %3995 = dma.vmem_to_hbm [thread:$0]  %s3993_s0, 32, %s5565_s19, [#allocation3]  }
0x2402   :  { %4741 = dma.done.wait [#allocation3], 32  }
0x2403   :  { %4742 = vsyncadd [#allocation3], 4294967264 }
0x2404   :  { %3999 = vsyncpa [#allocation3], 1 }

</bundles_post_ra>
